<compile_context>
chip_gen: v7x
topology: tpu7x:2x2x1
jax: 0.10.0
libtpu: 0.0.40
codegen_flags: <defaults>
</compile_context>

<pallas_src>
import functools

import numpy as np
import jax
import jax.numpy as jnp
from jax.experimental import pallas as pl
from jax.experimental.pallas import tpu as pltpu


# ---------------------------------------------------------------------------
# Fused kernel: in-kernel zero-pad + im2col tap slabs + ONE MXU contraction
# ---------------------------------------------------------------------------
def _fused_conv_fc_kernel(x_ref, w_ref, b_ref, o_ref, src_ref, a_ref, *,
                          Cin, H, W, PADL, SRC, TAP):
    """All VMEM resident.

    x_ref   : (B, Cin*H*W) f32  -- input, channel-major flat spatial axis.
    w_ref   : (Cin*9*TAP, NCLS) f32 -- folded conv*mask*fc weight (pad rows 0).
    b_ref   : (1, NCLS) f32     -- folded bias (fc bias + conv-bias term).
    o_ref   : (B, NCLS) f32     -- output.
    src_ref : (B, Cin*SRC) f32 scratch -- zero-padded per-channel rows; real
              pixels of channel ci live at lanes [ci*SRC+PADL, ci*SRC+PADL+HW).
    a_ref   : (B, Cin*9*TAP) f32 scratch -- im2col activation for the matmul.
    """
    HW = H * W

    # 1) Zero-padded source rows: vertical out-of-image taps must read real
    #    zeros (horizontal row-wrap taps are killed by the folded mask).
    src_ref[...] = jnp.zeros_like(src_ref)
    for ci in range(Cin):
        src_ref[:, ci * SRC + PADL: ci * SRC + PADL + HW] = (
            x_ref[:, ci * HW:(ci + 1) * HW])

    # 2) In-kernel im2col: 18 statically shifted, 128-lane tap slabs written at
    #    aligned offsets. Slab columns >= HW hit zero weight rows -> no mask.
    t = 0
    for ci in range(Cin):
        base = ci * SRC + PADL
        for kh in range(3):
            for kw in range(3):
                start = base + (kh - 1) * W + (kw - 1)   # static lane offset
                a_ref[:, t * TAP:(t + 1) * TAP] = src_ref[:, start:start + TAP]
                t += 1

    # 3) Single MXU contraction (B, 2304) @ (2304, NCLS) + folded bias.
    o_ref[...] = b_ref[...] + jnp.dot(a_ref[...], w_ref[...],
                                      preferred_element_type=jnp.float32)


# ---------------------------------------------------------------------------
# One-time weight fold (conv weights + tap masks + both biases -> FC weight)
# ---------------------------------------------------------------------------
def fold_params(conv_w, conv_b, fc_w, fc_b, H, W):
    f32 = jnp.float32
    Cout, Cin, KH, KW = conv_w.shape
    NCLS = fc_w.shape[0]
    HW = H * W
    KK = KH * KW
    TAP = 128

    # Structural tap-validity mask (trace-time numpy constant).
    mask = np.zeros((KK, HW), np.float32)
    for kh in range(KH):
        for kw in range(KW):
            k = kh * KW + kw
            for p in range(HW):
                h, w = divmod(p, W)
                if 0 <= h + kh - 1 < H and 0 <= w + kw - 1 < W:
                    mask[k, p] = 1.0
    mask = jnp.asarray(mask)

    cw = conv_w.reshape(Cout, Cin, KK).astype(f32)        # [o, i, k]
    fcw = fc_w.reshape(NCLS, Cout, HW).astype(f32)        # [n, o, p]

    # w_eff[i,k,n,p] = mask[k,p] * sum_o cw[o,i,k] * fcw[n,o,p]
    w_eff = jnp.einsum('oik,nop->iknp', cw, fcw) * mask[None, :, None, :]
    # Lay out as (Cin*9*TAP, NCLS): row i*9*TAP + k*TAP + j holds w_eff[i,k,:,j]
    # for j < HW and zeros for the per-slab pad columns j in [HW, TAP).
    w_eff = jnp.transpose(w_eff, (0, 1, 3, 2))            # (Cin, 9, HW, NCLS)
    w_eff = jnp.pad(w_eff, ((0, 0), (0, 0), (0, TAP - HW), (0, 0)))
    w2 = w_eff.reshape(Cin * KK * TAP, NCLS)

    # b_eff[n] = fc_b[n] + sum_o conv_b[o] * sum_p fcw[n,o,p]
    b_eff = fc_b.astype(f32) + jnp.einsum('o,nop->n', conv_b.astype(f32), fcw)
    return w2, b_eff.reshape(1, NCLS)


# ---------------------------------------------------------------------------
# Forward: free reshape + single pallas_call (3 operands)
# ---------------------------------------------------------------------------
@jax.jit
def test_conv_forward(x, w2, b_eff):
    f32 = jnp.float32
    B, Cin, H, W = x.shape
    HW = H * W
    NCLS = w2.shape[1]
    KK = 9
    TAP = 128
    NTAPS = Cin * KK
    assert w2.shape[0] == NTAPS * TAP
    PADL = W + 1                                     # |most negative tap offset|
    # Per-channel padded row length: must cover the widest 128-lane tap read.
    SRC = ((PADL + W + 1 + TAP + 127) // 128) * 128  # = 256 here

    # Contiguous collapse only (bitcast-level) -- no transpose, no pad in XLA.
    xflat = x.astype(f32).reshape(B, Cin * HW)

    kernel = functools.partial(_fused_conv_fc_kernel, Cin=Cin, H=H, W=W,
                               PADL=PADL, SRC=SRC, TAP=TAP)
    vmem = pl.BlockSpec(memory_space=pltpu.MemorySpace.VMEM)
    return pl.pallas_call(
        kernel,
        out_shape=jax.ShapeDtypeStruct((B, NCLS), f32),
        in_specs=[vmem, vmem, vmem],
        out_specs=vmem,
        scratch_shapes=[pltpu.VMEM((B, Cin * SRC), f32),
                        pltpu.VMEM((B, NTAPS * TAP), f32)],
    )(xflat, w2, b_eff)


# ---------------------------------------------------------------------------
# Pure-JAX reference (original, un-folded math) for correctness check
# ---------------------------------------------------------------------------
def reference_forward(x, conv_w, conv_b, fc_w, fc_b):
    conv_out = jax.lax.conv_general_dilated(
        x, conv_w, window_strides=(1, 1), padding="SAME",
        dimension_numbers=("NCHW", "OIHW", "NCHW"))
    conv_out = conv_out + conv_b[None, :, None, None]
    flat = conv_out.reshape(x.shape[0], -1)
    return flat @ fc_w.T + fc_b


if __name__ == "__main__":
    # Module-implied shapes: Cin=2, Cout=4, H=W=10, feature_size=400, classes=5
    B, Cin, Cout, H, W, NCLS = 2, 2, 4, 10, 10, 5
    feature_size = Cout * H * W  # 400

    key = jax.random.PRNGKey(0)
    kx, kcw, kcb, kfw, kfb = jax.random.split(key, 5)

    x = jax.random.normal(kx, (B, Cin, H, W), dtype=jnp.float32)
    conv_w = jax.random.normal(kcw, (Cout, Cin, 3, 3), dtype=jnp.float32) * 0.1
    conv_b = jax.random.normal(kcb, (Cout,), dtype=jnp.float32) * 0.1
    fc_w = jax.random.normal(kfw, (NCLS, feature_size), dtype=jnp.float32) * 0.05
    fc_b = jax.random.normal(kfb, (NCLS,), dtype=jnp.float32) * 0.05

    # One-time fold (module "parameters"); the hot path is the single kernel.
    w2, b_eff = fold_params(conv_w, conv_b, fc_w, fc_b, H, W)

    out = test_conv_forward(x, w2, b_eff)
    out = jax.block_until_ready(out)

    ref = reference_forward(x, conv_w, conv_b, fc_w, fc_b)
    assert out.shape == (B, NCLS), out.shape
    assert jnp.allclose(out, ref, atol=1e-4, rtol=1e-4), (
        f"max abs diff {jnp.max(jnp.abs(out - ref))}")

    print("KERNEL_OK")
</pallas_src>

<mosaic_0001>
module attributes {stable_mosaic.version = 11 : i64} {
  func.func @_fused_conv_fc_kernel(%arg0: memref<2x200xf32, #tpu.memory_space<vmem>>, %arg1: memref<2304x5xf32, #tpu.memory_space<vmem>>, %arg2: memref<1x5xf32, #tpu.memory_space<vmem>>, %arg3: memref<2x5xf32, #tpu.memory_space<vmem>>, %arg4: memref<2x512xf32, #tpu.memory_space<vmem>>, %arg5: memref<2x2304xf32, #tpu.memory_space<vmem>>) attributes {dimension_semantics = [], scalar_prefetch = 0 : i64, scratch_operands = 2 : i64, tpu.core_type = #tpu.core_type<tc>} {
    %cst = arith.constant 0.000000e+00 : f32
    %0 = vector.broadcast %cst : f32 to vector<2x512xf32>
    %c0 = arith.constant 0 : index
    %c0_0 = arith.constant 0 : index
    %1 = vector.load %arg4[%c0, %c0_0] : memref<2x512xf32, #tpu.memory_space<vmem>>, vector<2x512xf32>
    tpu.vector_store %arg4[%c0, %c0_0], %0 {strides = array<i32>} : memref<2x512xf32, #tpu.memory_space<vmem>>, vector<2x512xf32>,
    %c0_1 = arith.constant 0 : index
    %c0_2 = arith.constant 0 : index
    %2 = vector.load %arg0[%c0_1, %c0_2] : memref<2x200xf32, #tpu.memory_space<vmem>>, vector<2x100xf32>
    %c0_3 = arith.constant 0 : index
    %c11 = arith.constant 11 : index
    %3 = vector.load %arg4[%c0_3, %c11] : memref<2x512xf32, #tpu.memory_space<vmem>>, vector<2x100xf32>
    tpu.vector_store %arg4[%c0_3, %c11], %2 {strides = array<i32>} : memref<2x512xf32, #tpu.memory_space<vmem>>, vector<2x100xf32>,
    %c0_4 = arith.constant 0 : index
    %c100 = arith.constant 100 : index
    %4 = vector.load %arg0[%c0_4, %c100] : memref<2x200xf32, #tpu.memory_space<vmem>>, vector<2x100xf32>
    %c0_5 = arith.constant 0 : index
    %c267 = arith.constant 267 : index
    %5 = vector.load %arg4[%c0_5, %c267] : memref<2x512xf32, #tpu.memory_space<vmem>>, vector<2x100xf32>
    tpu.vector_store %arg4[%c0_5, %c267], %4 {strides = array<i32>} : memref<2x512xf32, #tpu.memory_space<vmem>>, vector<2x100xf32>,
    %c0_6 = arith.constant 0 : index
    %c0_7 = arith.constant 0 : index
    %6 = vector.load %arg4[%c0_6, %c0_7] : memref<2x512xf32, #tpu.memory_space<vmem>>, vector<2x128xf32>
    %c0_8 = arith.constant 0 : index
    %c0_9 = arith.constant 0 : index
    %7 = vector.load %arg5[%c0_8, %c0_9] : memref<2x2304xf32, #tpu.memory_space<vmem>>, vector<2x128xf32>
    tpu.vector_store %arg5[%c0_8, %c0_9], %6 {strides = array<i32>} : memref<2x2304xf32, #tpu.memory_space<vmem>>, vector<2x128xf32>,
    %c0_10 = arith.constant 0 : index
    %c1 = arith.constant 1 : index
    %8 = vector.load %arg4[%c0_10, %c1] : memref<2x512xf32, #tpu.memory_space<vmem>>, vector<2x128xf32>
    %c0_11 = arith.constant 0 : index
    %c128 = arith.constant 128 : index
    %9 = vector.load %arg5[%c0_11, %c128] : memref<2x2304xf32, #tpu.memory_space<vmem>>, vector<2x128xf32>
    tpu.vector_store %arg5[%c0_11, %c128], %8 {strides = array<i32>} : memref<2x2304xf32, #tpu.memory_space<vmem>>, vector<2x128xf32>,
    %c0_12 = arith.constant 0 : index
    %c2 = arith.constant 2 : index
    %10 = vector.load %arg4[%c0_12, %c2] : memref<2x512xf32, #tpu.memory_space<vmem>>, vector<2x128xf32>
    %c0_13 = arith.constant 0 : index
    %c256 = arith.constant 256 : index
    %11 = vector.load %arg5[%c0_13, %c256] : memref<2x2304xf32, #tpu.memory_space<vmem>>, vector<2x128xf32>
    tpu.vector_store %arg5[%c0_13, %c256], %10 {strides = array<i32>} : memref<2x2304xf32, #tpu.memory_space<vmem>>, vector<2x128xf32>,
    %c0_14 = arith.constant 0 : index
    %c10 = arith.constant 10 : index
    %12 = vector.load %arg4[%c0_14, %c10] : memref<2x512xf32, #tpu.memory_space<vmem>>, vector<2x128xf32>
    %c0_15 = arith.constant 0 : index
    %c384 = arith.constant 384 : index
    %13 = vector.load %arg5[%c0_15, %c384] : memref<2x2304xf32, #tpu.memory_space<vmem>>, vector<2x128xf32>
    tpu.vector_store %arg5[%c0_15, %c384], %12 {strides = array<i32>} : memref<2x2304xf32, #tpu.memory_space<vmem>>, vector<2x128xf32>,
    %c0_16 = arith.constant 0 : index
    %c11_17 = arith.constant 11 : index
    %14 = vector.load %arg4[%c0_16, %c11_17] : memref<2x512xf32, #tpu.memory_space<vmem>>, vector<2x128xf32>
    %c0_18 = arith.constant 0 : index
    %c512 = arith.constant 512 : index
    %15 = vector.load %arg5[%c0_18, %c512] : memref<2x2304xf32, #tpu.memory_space<vmem>>, vector<2x128xf32>
    tpu.vector_store %arg5[%c0_18, %c512], %14 {strides = array<i32>} : memref<2x2304xf32, #tpu.memory_space<vmem>>, vector<2x128xf32>,
    %c0_19 = arith.constant 0 : index
    %c12 = arith.constant 12 : index
    %16 = vector.load %arg4[%c0_19, %c12] : memref<2x512xf32, #tpu.memory_space<vmem>>, vector<2x128xf32>
    %c0_20 = arith.constant 0 : index
    %c640 = arith.constant 640 : index
    %17 = vector.load %arg5[%c0_20, %c640] : memref<2x2304xf32, #tpu.memory_space<vmem>>, vector<2x128xf32>
    tpu.vector_store %arg5[%c0_20, %c640], %16 {strides = array<i32>} : memref<2x2304xf32, #tpu.memory_space<vmem>>, vector<2x128xf32>,
    %c0_21 = arith.constant 0 : index
    %c20 = arith.constant 20 : index
    %18 = vector.load %arg4[%c0_21, %c20] : memref<2x512xf32, #tpu.memory_space<vmem>>, vector<2x128xf32>
    %c0_22 = arith.constant 0 : index
    %c768 = arith.constant 768 : index
    %19 = vector.load %arg5[%c0_22, %c768] : memref<2x2304xf32, #tpu.memory_space<vmem>>, vector<2x128xf32>
    tpu.vector_store %arg5[%c0_22, %c768], %18 {strides = array<i32>} : memref<2x2304xf32, #tpu.memory_space<vmem>>, vector<2x128xf32>,
    %c0_23 = arith.constant 0 : index
    %c21 = arith.constant 21 : index
    %20 = vector.load %arg4[%c0_23, %c21] : memref<2x512xf32, #tpu.memory_space<vmem>>, vector<2x128xf32>
    %c0_24 = arith.constant 0 : index
    %c896 = arith.constant 896 : index
    %21 = vector.load %arg5[%c0_24, %c896] : memref<2x2304xf32, #tpu.memory_space<vmem>>, vector<2x128xf32>
    tpu.vector_store %arg5[%c0_24, %c896], %20 {strides = array<i32>} : memref<2x2304xf32, #tpu.memory_space<vmem>>, vector<2x128xf32>,
    %c0_25 = arith.constant 0 : index
    %c22 = arith.constant 22 : index
    %22 = vector.load %arg4[%c0_25, %c22] : memref<2x512xf32, #tpu.memory_space<vmem>>, vector<2x128xf32>
    %c0_26 = arith.constant 0 : index
    %c1024 = arith.constant 1024 : index
    %23 = vector.load %arg5[%c0_26, %c1024] : memref<2x2304xf32, #tpu.memory_space<vmem>>, vector<2x128xf32>
    tpu.vector_store %arg5[%c0_26, %c1024], %22 {strides = array<i32>} : memref<2x2304xf32, #tpu.memory_space<vmem>>, vector<2x128xf32>,
    %c0_27 = arith.constant 0 : index
    %c256_28 = arith.constant 256 : index
    %24 = vector.load %arg4[%c0_27, %c256_28] : memref<2x512xf32, #tpu.memory_space<vmem>>, vector<2x128xf32>
    %c0_29 = arith.constant 0 : index
    %c1152 = arith.constant 1152 : index
    %25 = vector.load %arg5[%c0_29, %c1152] : memref<2x2304xf32, #tpu.memory_space<vmem>>, vector<2x128xf32>
    tpu.vector_store %arg5[%c0_29, %c1152], %24 {strides = array<i32>} : memref<2x2304xf32, #tpu.memory_space<vmem>>, vector<2x128xf32>,
    %c0_30 = arith.constant 0 : index
    %c257 = arith.constant 257 : index
    %26 = vector.load %arg4[%c0_30, %c257] : memref<2x512xf32, #tpu.memory_space<vmem>>, vector<2x128xf32>
    %c0_31 = arith.constant 0 : index
    %c1280 = arith.constant 1280 : index
    %27 = vector.load %arg5[%c0_31, %c1280] : memref<2x2304xf32, #tpu.memory_space<vmem>>, vector<2x128xf32>
    tpu.vector_store %arg5[%c0_31, %c1280], %26 {strides = array<i32>} : memref<2x2304xf32, #tpu.memory_space<vmem>>, vector<2x128xf32>,
    %c0_32 = arith.constant 0 : index
    %c258 = arith.constant 258 : index
    %28 = vector.load %arg4[%c0_32, %c258] : memref<2x512xf32, #tpu.memory_space<vmem>>, vector<2x128xf32>
    %c0_33 = arith.constant 0 : index
    %c1408 = arith.constant 1408 : index
    %29 = vector.load %arg5[%c0_33, %c1408] : memref<2x2304xf32, #tpu.memory_space<vmem>>, vector<2x128xf32>
    tpu.vector_store %arg5[%c0_33, %c1408], %28 {strides = array<i32>} : memref<2x2304xf32, #tpu.memory_space<vmem>>, vector<2x128xf32>,
    %c0_34 = arith.constant 0 : index
    %c266 = arith.constant 266 : index
    %30 = vector.load %arg4[%c0_34, %c266] : memref<2x512xf32, #tpu.memory_space<vmem>>, vector<2x128xf32>
    %c0_35 = arith.constant 0 : index
    %c1536 = arith.constant 1536 : index
    %31 = vector.load %arg5[%c0_35, %c1536] : memref<2x2304xf32, #tpu.memory_space<vmem>>, vector<2x128xf32>
    tpu.vector_store %arg5[%c0_35, %c1536], %30 {strides = array<i32>} : memref<2x2304xf32, #tpu.memory_space<vmem>>, vector<2x128xf32>,
    %c0_36 = arith.constant 0 : index
    %c267_37 = arith.constant 267 : index
    %32 = vector.load %arg4[%c0_36, %c267_37] : memref<2x512xf32, #tpu.memory_space<vmem>>, vector<2x128xf32>
    %c0_38 = arith.constant 0 : index
    %c1664 = arith.constant 1664 : index
    %33 = vector.load %arg5[%c0_38, %c1664] : memref<2x2304xf32, #tpu.memory_space<vmem>>, vector<2x128xf32>
    tpu.vector_store %arg5[%c0_38, %c1664], %32 {strides = array<i32>} : memref<2x2304xf32, #tpu.memory_space<vmem>>, vector<2x128xf32>,
    %c0_39 = arith.constant 0 : index
    %c268 = arith.constant 268 : index
    %34 = vector.load %arg4[%c0_39, %c268] : memref<2x512xf32, #tpu.memory_space<vmem>>, vector<2x128xf32>
    %c0_40 = arith.constant 0 : index
    %c1792 = arith.constant 1792 : index
    %35 = vector.load %arg5[%c0_40, %c1792] : memref<2x2304xf32, #tpu.memory_space<vmem>>, vector<2x128xf32>
    tpu.vector_store %arg5[%c0_40, %c1792], %34 {strides = array<i32>} : memref<2x2304xf32, #tpu.memory_space<vmem>>, vector<2x128xf32>,
    %c0_41 = arith.constant 0 : index
    %c276 = arith.constant 276 : index
    %36 = vector.load %arg4[%c0_41, %c276] : memref<2x512xf32, #tpu.memory_space<vmem>>, vector<2x128xf32>
    %c0_42 = arith.constant 0 : index
    %c1920 = arith.constant 1920 : index
    %37 = vector.load %arg5[%c0_42, %c1920] : memref<2x2304xf32, #tpu.memory_space<vmem>>, vector<2x128xf32>
    tpu.vector_store %arg5[%c0_42, %c1920], %36 {strides = array<i32>} : memref<2x2304xf32, #tpu.memory_space<vmem>>, vector<2x128xf32>,
    %c0_43 = arith.constant 0 : index
    %c277 = arith.constant 277 : index
    %38 = vector.load %arg4[%c0_43, %c277] : memref<2x512xf32, #tpu.memory_space<vmem>>, vector<2x128xf32>
    %c0_44 = arith.constant 0 : index
    %c2048 = arith.constant 2048 : index
    %39 = vector.load %arg5[%c0_44, %c2048] : memref<2x2304xf32, #tpu.memory_space<vmem>>, vector<2x128xf32>
    tpu.vector_store %arg5[%c0_44, %c2048], %38 {strides = array<i32>} : memref<2x2304xf32, #tpu.memory_space<vmem>>, vector<2x128xf32>,
    %c0_45 = arith.constant 0 : index
    %c278 = arith.constant 278 : index
    %40 = vector.load %arg4[%c0_45, %c278] : memref<2x512xf32, #tpu.memory_space<vmem>>, vector<2x128xf32>
    %c0_46 = arith.constant 0 : index
    %c2176 = arith.constant 2176 : index
    %41 = vector.load %arg5[%c0_46, %c2176] : memref<2x2304xf32, #tpu.memory_space<vmem>>, vector<2x128xf32>
    tpu.vector_store %arg5[%c0_46, %c2176], %40 {strides = array<i32>} : memref<2x2304xf32, #tpu.memory_space<vmem>>, vector<2x128xf32>,
    %c0_47 = arith.constant 0 : index
    %c0_48 = arith.constant 0 : index
    %42 = vector.load %arg2[%c0_47, %c0_48] : memref<1x5xf32, #tpu.memory_space<vmem>>, vector<1x5xf32>
    %c0_49 = arith.constant 0 : index
    %c0_50 = arith.constant 0 : index
    %43 = vector.load %arg5[%c0_49, %c0_50] : memref<2x2304xf32, #tpu.memory_space<vmem>>, vector<2x2304xf32>
    %c0_51 = arith.constant 0 : index
    %c0_52 = arith.constant 0 : index
    %44 = vector.load %arg1[%c0_51, %c0_52] : memref<2304x5xf32, #tpu.memory_space<vmem>>, vector<2304x5xf32>
    %cst_53 = arith.constant dense<0.000000e+00> : vector<2x5xf32>
    %45 = tpu.matmul %43, %44, %cst_53 {dimension_numbers = #tpu.dot_dimension_numbers<[1], [0], [0], [1], [0, 0, 1, 1], [], []>} : vector<2x2304xf32>, vector<2304x5xf32>, vector<2x5xf32> -> vector<2x5xf32>
    %46 = vector.broadcast %42 : vector<1x5xf32> to vector<2x5xf32>
    %47 = arith.addf %46, %45 : vector<2x5xf32>
    %c0_54 = arith.constant 0 : index
    %c0_55 = arith.constant 0 : index
    %48 = vector.load %arg3[%c0_54, %c0_55] : memref<2x5xf32, #tpu.memory_space<vmem>>, vector<2x5xf32>
    tpu.vector_store %arg3[%c0_54, %c0_55], %47 {strides = array<i32>} : memref<2x5xf32, #tpu.memory_space<vmem>>, vector<2x5xf32>,
    return
  }
}

</mosaic_0001>

<bundles_post_ra>
// kernel: test_conv_forward.1
= control target key start
LH: loop header
LB: loop body
LE: loop exit
PB: predicated region body
PF: predicated region fallthrough
CT: control target
= control target key end

     0   :  { %s1864_s14 = smov 11   ;;  %v1865_v2 = vmov 0.0   ;;  %s2855_s0 = inlined_call_operand.vmem [shape: f32[2,200], index: 0, kind: input, shape index: {}]   ;;  %s2856_s1 = inlined_call_operand.vmem [shape: f32[2304,5], index: 1, kind: input, shape index: {}]   ;;  %s2857_s2 = inlined_call_operand.vmem [shape: f32[1,5], index: 2, kind: input, shape index: {}]   ;;  %s2858_s3 = inlined_call_operand.hbm [shape: f32[2,5], index: 3, kind: output, shape index: {}]  }
   0x1   :  { %v16_v0 = vld [vmem:[%s2855_s0] sm:$0x3]  ;;  %15 = vst [vmem:[#allocation2] sm:$0xff] %v1865_v2 }
   0x2   :  { %18 = vrot.lane.b32.xlu0 %v16_v0, %s1864_s14  ;;  %v23_v1 = vld [vmem:[%s2855_s0] sm:$0xf] }
   0x3   :  { %8 = vsyncpa [#allocation5], 0  ;;  %s1866_s17 = smov 39   ;;  %v194_v3 = vld [vmem:[%s2856_s1 + $0x80] sm:$0xff]  ;;  %v195_v4 = vld [vmem:[%s2856_s1 + $0x88] sm:$0xff]  ;;  %vm21_vm0 = vcmask 902232  }
   0x4   :  { %v178_v5 = vld [vmem:[%s2856_s1] sm:$0xff]  ;;  %v1535_v6 = vpack.c.bf16 %v195_v4, %v194_v3  ;;  %v179_v7 = vld [vmem:[%s2856_s1 + $0x8] sm:$0xff]  ;;  %v196_v14 = vld [vmem:[%s2856_s1 + $0x90] sm:$0xff]  ;;  %vm28_vm1 = vcmask 318464   ;;  %s1867_s10 = smov 118   ;;  %s1868_s11 = smov 127  }
   0x5   :  { %v226_v8 = vld [vmem:[%s2856_s1 + $0x180] sm:$0xff]  ;;  %v227_v9 = vld [vmem:[%s2856_s1 + $0x188] sm:$0xff]  ;;  %v1537_v10 = vpack.c.bf16 %v179_v7, %v178_v5  ;;  %v197_v16 = vld [vmem:[%s2856_s1 + $0x98] sm:$0xff]  ;;  %s1869_s24 = smov 116   ;;  %s1870_s0 = smov 126   ;;  %vm57_vm2 = vcmask 965632  }
   0x6   :  { %25 = vrot.lane.b32.xlu0 %v23_v1, %s1866_s17  ;;  %v1567_v11 = vpack.c.bf16 %v227_v9, %v226_v8  ;;  %v210_v12 = vld [vmem:[%s2856_s1 + $0x100] sm:$0xff]  ;;  %v211_v13 = vld [vmem:[%s2856_s1 + $0x108] sm:$0xff]  ;;  %1536 = vmatprep.subr.bf16.mxu0 %v1535_v6  ;;  %v180_v17 = vld [vmem:[%s2856_s1 + $0x10] sm:$0xff]  ;;  %v1539_v19 = vpack.c.bf16 %v197_v16, %v196_v14  ;;  %s1871_s8 = smov 107   ;;  %s1872_s9 = smov 117   ;;  %vm39_vm3 = vcmask 1039360  }
   0x7   :  { %v1569_v15 = vpack.c.bf16 %v211_v13, %v210_v12  ;;  %v181_v18 = vld [vmem:[%s2856_s1 + $0x18] sm:$0xff]  ;;  %1538 = vmatpush3.bf16.msra.mxu0 %v1537_v10  ;;  %v228_v21 = vld [vmem:[%s2856_s1 + $0x190] sm:$0xff]  ;;  %v198_v26 = vld [vmem:[%s2856_s1 + $0xa0] sm:$0xff]  ;;  %s1873_s22 = smov 108   ;;  %s1874_s23 = smov 106   ;;  %vm75_vm4 = vcmask 949248  }
   0x8   :  { %1568 = vmatprep.subr.bf16.mxu1 %v1567_v11  ;;  %v1541_v20 = vpack.c.bf16 %v181_v18, %v180_v17  ;;  %v229_v22 = vld [vmem:[%s2856_s1 + $0x198] sm:$0xff]  ;;  %v212_v23 = vld [vmem:[%s2856_s1 + $0x110] sm:$0xff]  ;;  %v199_v27 = vld [vmem:[%s2856_s1 + $0xa8] sm:$0xff]  ;;  %1540 = vmatprep.subr.bf16.mxu0 %v1539_v19  ;;  %vm48_vm5 = vcmask 1031168   ;;  %vm93_vm6 = vcmask 875520   ;;  %vm66_vm7 = vcmask 957440  }
   0x9   :  { %1570 = vmatpush3.bf16.msra.mxu1 %v1569_v15  ;;  %v1571_v24 = vpack.c.bf16 %v229_v22, %v228_v21  ;;  %v213_v25 = vld [vmem:[%s2856_s1 + $0x118] sm:$0xff]  ;;  %v1543_v29 = vpack.c.bf16 %v199_v27, %v198_v26  ;;  %v182_v30 = vld [vmem:[%s2856_s1 + $0x20] sm:$0xff]  ;;  %v183_v31 = vld [vmem:[%s2856_s1 + $0x28] sm:$0xff]  ;;  %vm84_vm8 = vcmask 883712   ;;  %vm102_vm9 = vcmask 867328   ;;  %s1876_s17 = smov [#allocation4]  }
   0xa   :  { %v1573_v28 = vpack.c.bf16 %v213_v25, %v212_v23  ;;  %v230_v32 = vld [vmem:[%s2856_s1 + $0x1a0] sm:$0xff]  ;;  %v231_v33 = vld [vmem:[%s2856_s1 + $0x1a8] sm:$0xff]  ;;  %v1545_v36 = vpack.c.bf16 %v183_v31, %v182_v30  ;;  %v200_v38 = vld [vmem:[%s2856_s1 + $0xb0] sm:$0xff]  ;;  %s1210_s18 = sshll.u32 %s1876_s17, 4  ;;  %vm1202_vm10 = vcmask 33792   ;;  %s1211_s18 = int_to_ptr.vmem [resolvable:$true] %s1210_s18 }
   0xb   :  { %1572 = vmatprep.subr.bf16.mxu1 %v1571_v24  ;;  %v214_v34 = vld [vmem:[%s2856_s1 + $0x120] sm:$0xff]  ;;  %v215_v35 = vld [vmem:[%s2856_s1 + $0x128] sm:$0xff]  ;;  %1542 = vmatpush3.bf16.msra.mxu0 %v1541_v20  ;;  %v1575_v37 = vpack.c.bf16 %v231_v33, %v230_v32  ;;  %v201_v39 = vld [vmem:[%s2856_s1 + $0xb8] sm:$0xff]  ;;  %s1840_s19 = scalar_lea.vmem %s1211_s18, 32  ;;  %p1845_p1 = scmp.lt.s32.totalorder %s1211_s18, %s1211_s18 }
   0xc   :  { %1544 = vmatprep.subr.bf16.mxu0 %v1543_v29  ;;  %v1577_v40 = vpack.c.bf16 %v215_v35, %v214_v34  ;;  %v1547_v41 = vpack.c.bf16 %v201_v39, %v200_v38  ;;  %v184_v42 = vld [vmem:[%s2856_s1 + $0x30] sm:$0xff]  ;;  %v185_v43 = vld [vmem:[%s2856_s1 + $0x38] sm:$0xff]  ;;  %v202_v51 = vld [vmem:[%s2856_s1 + $0xc0] sm:$0xff]  ;;  %p1841_p0 = scmp.ne.s32.totalorder %s1211_s18, %s1840_s19  ;;  %p1846_p2 = scmp.lt.s32.totalorder %s1840_s19, %s1840_s19 }
   0xd   :  { %1574 = vmatpush3.bf16.msra.mxu1 %v1573_v28  ;;  %v1549_v44 = vpack.c.bf16 %v185_v43, %v184_v42  ;;  %v232_v45 = vld [vmem:[%s2856_s1 + $0x1b0] sm:$0xff]  ;;  %v233_v46 = vld [vmem:[%s2856_s1 + $0x1b8] sm:$0xff]  ;;  %v203_v52 = vld [vmem:[%s2856_s1 + $0xc8] sm:$0xff] }
   0xe   :  { %1576 = vmatprep.subr.bf16.mxu1 %v1575_v37  ;;  %v1579_v47 = vpack.c.bf16 %v233_v46, %v232_v45  ;;  %v216_v48 = vld [vmem:[%s2856_s1 + $0x130] sm:$0xff]  ;;  %v217_v49 = vld [vmem:[%s2856_s1 + $0x138] sm:$0xff]  ;;  %v1551_v53 = vpack.c.bf16 %v203_v52, %v202_v51  ;;  %v186_v54 = vld [vmem:[%s2856_s1 + $0x40] sm:$0xff]  ;;  %p1847_p3 = por %p1846_p2, %p1845_p1 }
   0xf   :  { %1546 = vmatpush3.bf16.msra.mxu0 %v1545_v36  ;;  %v1581_v50 = vpack.c.bf16 %v217_v49, %v216_v48  ;;  %v187_v55 = vld [vmem:[%s2856_s1 + $0x48] sm:$0xff]  ;;  %v234_v58 = vld [vmem:[%s2856_s1 + $0x1c0] sm:$0xff]  ;;  %v204_v0 = vld [vmem:[%s2856_s1 + $0xd0] sm:$0xff] }
  0x10   :  { %1548 = vmatprep.subr.bf16.mxu0 %v1547_v41  ;;  %v1553_v57 = vpack.c.bf16 %v187_v55, %v186_v54  ;;  %v235_v59 = vld [vmem:[%s2856_s1 + $0x1c8] sm:$0xff]  ;;  %v218_v61 = vld [vmem:[%s2856_s1 + $0x140] sm:$0xff]  ;;  %v205_v1 = vld [vmem:[%s2856_s1 + $0xd8] sm:$0xff]  ;;  %p1848_p4 = pnand %p1847_p3, %p1841_p0 }
  0x11   :  { %1578 = vmatpush3.bf16.msra.mxu1 %v1577_v40  ;;  %v1583_v60 = vpack.c.bf16 %v235_v59, %v234_v58  ;;  %v219_v62 = vld [vmem:[%s2856_s1 + $0x148] sm:$0xff]  ;;  %v1555_v2 = vpack.c.bf16 %v205_v1, %v204_v0  ;;  %v188_v3 = vld [vmem:[%s2856_s1 + $0x50] sm:$0xff]  ;;  %v189_v4 = vld [vmem:[%s2856_s1 + $0x58] sm:$0xff] }
  0x12   :  { %1580 = vmatprep.subr.bf16.mxu1 %v1579_v47  ;;  %v1585_v63 = vpack.c.bf16 %v219_v62, %v218_v61  ;;  %v1557_v6 = vpack.c.bf16 %v189_v4, %v188_v3  ;;  %v236_v7 = vld [vmem:[%s2856_s1 + $0x1d0] sm:$0xff]  ;;  %v237_v8 = vld [vmem:[%s2856_s1 + $0x1d8] sm:$0xff]  ;;  %v206_v14 = vld [vmem:[%s2856_s1 + $0xe0] sm:$0xff] }
  0x13   :  { %1550 = vmatpush3.bf16.msra.mxu0 %v1549_v44  ;;  %v1587_v10 = vpack.c.bf16 %v237_v8, %v236_v7  ;;  %v220_v11 = vld [vmem:[%s2856_s1 + $0x150] sm:$0xff]  ;;  %v221_v12 = vld [vmem:[%s2856_s1 + $0x158] sm:$0xff]  ;;  %v207_v15 = vld [vmem:[%s2856_s1 + $0xe8] sm:$0xff]  ;;  %v1875_v7 = vmov 1983009808  }
  0x14   :  { %1552 = vmatprep.subr.bf16.mxu0 %v1551_v53  ;;  %v1589_v13 = vpack.c.bf16 %v221_v12, %v220_v11  ;;  %v1559_v17 = vpack.c.bf16 %v207_v15, %v206_v14  ;;  %v190_v18 = vld [vmem:[%s2856_s1 + $0x60] sm:$0xff]  ;;  %v191_v19 = vld [vmem:[%s2856_s1 + $0x68] sm:$0xff]  ;;  %v208_v31 = vld [vmem:[%s2856_s1 + $0xf0] sm:$0xff]  ;;  %v473_v8 = vunpack.c.l.s4 %v1875_v7 }
  0x15   :  { %1582 = vmatpush3.bf16.msra.mxu1 %v1581_v50  ;;  %v1561_v23 = vpack.c.bf16 %v191_v19, %v190_v18  ;;  %v238_v26 = vld [vmem:[%s2856_s1 + $0x1e0] sm:$0xff]  ;;  %v239_v27 = vld [vmem:[%s2856_s1 + $0x1e8] sm:$0xff]  ;;  %v209_v32 = vld [vmem:[%s2856_s1 + $0xf8] sm:$0xff] }
  0x16   :  { %1584 = vmatprep.subr.bf16.mxu1 %v1583_v60  ;;  %v222_v28 = vld [vmem:[%s2856_s1 + $0x160] sm:$0xff]  ;;  %v1591_v29 = vpack.c.bf16 %v239_v27, %v238_v26  ;;  %v223_v30 = vld [vmem:[%s2856_s1 + $0x168] sm:$0xff]  ;;  %v1563_v34 = vpack.c.bf16 %v209_v32, %v208_v31  ;;  %v192_v35 = vld [vmem:[%s2856_s1 + $0x70] sm:$0xff] }
  0x17   :  { %1554 = vmatpush3.bf16.msra.mxu0 %v1553_v57  ;;  %v1593_v33 = vpack.c.bf16 %v223_v30, %v222_v28  ;;  %v193_v36 = vld [vmem:[%s2856_s1 + $0x78] sm:$0xff]  ;;  %v240_v38 = vld [vmem:[%s2856_s1 + $0x1f0] sm:$0xff]  ;;  %v258_v47 = vld [vmem:[%s2856_s1 + $0x280] sm:$0xff] }
  0x18   :  { %1556 = vmatprep.subr.bf16.mxu0 %v1555_v2  ;;  %v1565_v37 = vpack.c.bf16 %v193_v36, %v192_v35  ;;  %v241_v39 = vld [vmem:[%s2856_s1 + $0x1f8] sm:$0xff]  ;;  %v224_v44 = vld [vmem:[%s2856_s1 + $0x170] sm:$0xff]  ;;  %v259_v48 = vld [vmem:[%s2856_s1 + $0x288] sm:$0xff] }
  0x19   :  { %1586 = vmatpush3.bf16.msra.mxu1 %v1585_v63  ;;  %v1595_v41 = vpack.c.bf16 %v241_v39, %v240_v38  ;;  %v225_v46 = vld [vmem:[%s2856_s1 + $0x178] sm:$0xff]  ;;  %v1599_v50 = vpack.c.bf16 %v259_v48, %v258_v47  ;;  %v290_v51 = vld [vmem:[%s2856_s1 + $0x380] sm:$0xff]  ;;  %v291_v53 = vld [vmem:[%s2856_s1 + $0x388] sm:$0xff] }
  0x1a   :  { %1588 = vmatprep.subr.bf16.mxu1 %v1587_v10  ;;  %v1597_v49 = vpack.c.bf16 %v225_v46, %v224_v44  ;;  %v1631_v54 = vpack.c.bf16 %v291_v53, %v290_v51  ;;  %v242_v30 = vld [vmem:[%s2856_s1 + $0x200] sm:$0xff]  ;;  %v243_v31 = vld [vmem:[%s2856_s1 + $0x208] sm:$0xff]  ;;  %v260_v35 = vld [vmem:[%s2856_s1 + $0x290] sm:$0xff] }
  0x1b   :  { %1558 = vmatpush3.bf16.msra.mxu0 %v1557_v6  ;;  %v261_v36 = vld [vmem:[%s2856_s1 + $0x298] sm:$0xff]  ;;  %v274_v39 = vld [vmem:[%s2856_s1 + $0x300] sm:$0xff] }
  0x1c   :  { %1560 = vmatprep.subr.bf16.mxu0 %v1559_v17  ;;  %v293_v46 = vld [vmem:[%s2856_s1 + $0x398] sm:$0xff]  ;;  %v1603_v48 = vpack.c.bf16 %v261_v36, %v260_v35 }
  0x1d   :  { %1590 = vmatpush3.bf16.msra.mxu1 %v1589_v13 }
  0x1e   :  { %1592 = vmatprep.subr.bf16.mxu1 %v1591_v29 }
  0x1f   :  { %1562 = vmatpush3.bf16.msra.mxu0 %v1561_v23 }
  0x20   :  { %1564 = vmatprep.subr.bf16.mxu0 %v1563_v34 }
  0x21   :  { %1594 = vmatpush3.bf16.msra.mxu1 %v1593_v33 }
  0x22   :  { %1596 = vmatprep.subr.bf16.mxu1 %v1595_v41 }
  0x23   :  { %1566 = vmatpush3.bf16.msra.mxu0 %v1565_v37 }
  0x24   :  { %1600 = vmatprep.subr.bf16.mxu0 %v1599_v50  ;;  %v245_v50 = vld [vmem:[%s2856_s1 + $0x218] sm:$0xff] }
  0x25   :  { %1598 = vmatpush3.bf16.msra.mxu1 %v1597_v49  ;;  %v244_v49 = vld [vmem:[%s2856_s1 + $0x210] sm:$0xff] }
  0x26   :  { %1632 = vmatprep.subr.bf16.mxu1 %v1631_v54 }
  0x74   :  { %v19_v56 = vpop.permute.xlu0 %18 }
  0x75   :  { %22 = vst.msk [vmem:[#allocation2] sm:$0x3] %vm21_vm0, %v19_v56 }
  0x78   :  { %v26_v5 = vpop.permute.xlu0 %25 }
  0x79   :  { %v27_v9 = vrot.slane %v26_v5, 2 }
  0x7b   :  { %v29_v16 = vsel %vm28_vm1, %v26_v5, %v27_v9  ;;  %v475_v9 = vlaneseq }
  0x7c   :  { %v32_v20 = vld [vmem:[#allocation2] sm:$0x3]  ;;  %31 = vst.msk [vmem:[#allocation2 + $0x4] sm:$0x3] %vm21_vm0, %v29_v16  ;;  %v474_v16 = vunpack.c.0.s8 %v473_v8 }
  0x7d   :  { %v52_v21 = vld [vmem:[#allocation2] sm:$0xf]  ;;  %33 = vst [vmem:[#allocation3] sm:$0x3] %v32_v20  ;;  %v476_v17 = vshrl.u32 %v475_v9, 7 }
  0x7e   :  { %v34_v22 = vld [vmem:[#allocation2] sm:$0xf]  ;;  %54 = vrot.lane.b32.xlu0 %v52_v21, %s1867_s10 }
  0x7f   :  { %36 = vrot.lane.b32.xlu1 %v34_v22, %s1868_s11  ;;  %v70_v24 = vld [vmem:[#allocation2] sm:$0xf] }
  0x80   :  { %v43_v25 = vld [vmem:[#allocation2] sm:$0xf] }
  0x81   :  { %v88_v42 = vld [vmem:[#allocation2] sm:$0xf] }
  0x82   :  { %72 = vrot.lane.b32.xlu0 %v70_v24, %s1869_s24  ;;  %v61_v43 = vld [vmem:[#allocation2] sm:$0xf]  ;;  %v2125_v24 = vsub.s32 %v474_v16, %v476_v17  ;;  %v279_v17 = vld [vmem:[%s2856_s1 + $0x328] sm:$0xff] }
  0x83   :  { %45 = vrot.lane.b32.xlu1 %v43_v25, %s1870_s0  ;;  %v106_v40 = vld [vmem:[#allocation2 + $0x4] sm:$0x3]  ;;  %v79_v52 = vld [vmem:[#allocation2] sm:$0xf] }
  0x84   :  { %107 = vst [vmem:[#allocation3 + $0x12] sm:$0x3] %v106_v40  ;;  %v108_v45 = vld [vmem:[#allocation2 + $0x4] sm:$0xf]  ;;  %v97_v56 = vld [vmem:[#allocation2] sm:$0xf] }
  0x85   :  { %v124_v55 = vld [vmem:[#allocation2 + $0x4] sm:$0xf]  ;;  %v275_v40 = vld [vmem:[%s2856_s1 + $0x308] sm:$0xff] }
  0x86   :  { %90 = vrot.lane.b32.xlu0 %v88_v42, %s1871_s8  ;;  %v116_v57 = vld [vmem:[#allocation2 + $0x4] sm:$0xf]  ;;  %v1633_v54 = vpack.c.bf16 %v275_v40, %v274_v39 }
  0x87   :  { %63 = vrot.lane.b32.xlu1 %v61_v43, %s1872_s9  ;;  %v140_v58 = vld [vmem:[#allocation2 + $0x4] sm:$0xf]  ;;  %v1601_v43 = vpack.c.bf16 %v243_v31, %v242_v30 }
  0x88   :  { %v132_v59 = vld [vmem:[#allocation2 + $0x4] sm:$0xf] }
  0x89   :  { %v156_v60 = vld [vmem:[#allocation2 + $0x4] sm:$0xf] }
  0x8a   :  { %110 = vrot.lane.b32.xlu0 %v108_v45, %s1868_s11  ;;  %v148_v61 = vld [vmem:[#allocation2 + $0x4] sm:$0xf]  ;;  %v292_v45 = vld [vmem:[%s2856_s1 + $0x390] sm:$0xff] }
  0x8b   :  { %81 = vrot.lane.b32.xlu1 %v79_v52, %s1873_s22  ;;  %v164_v62 = vld [vmem:[#allocation2 + $0x4] sm:$0xf] }
  0x8c   :  { %v278_v16 = vld [vmem:[%s2856_s1 + $0x320] sm:$0xff] }
  0x8e   :  { %126 = vrot.lane.b32.xlu0 %v124_v55, %s1867_s10  ;;  %v262_v55 = vld [vmem:[%s2856_s1 + $0x2a0] sm:$0xff] }
  0x8f   :  { %99 = vrot.lane.b32.xlu1 %v97_v56, %s1874_s23  ;;  %v263_v56 = vld [vmem:[%s2856_s1 + $0x2a8] sm:$0xff] }
  0x92   :  { %142 = vrot.lane.b32.xlu0 %v140_v58, %s1869_s24 }
  0x93   :  { %118 = vrot.lane.b32.xlu1 %v116_v57, %s1870_s0 }
  0x96   :  { %158 = vrot.lane.b32.xlu0 %v156_v60, %s1871_s8  ;;  %v276_v60 = vld [vmem:[%s2856_s1 + $0x310] sm:$0xff] }
  0x97   :  { %134 = vrot.lane.b32.xlu1 %v132_v59, %s1872_s9  ;;  %v1635_v59 = vpack.c.bf16 %v293_v46, %v292_v45  ;;  %v251_v45 = vld [vmem:[%s2856_s1 + $0x248] sm:$0xff] }
  0x9b   :  { %150 = vrot.lane.b32.xlu1 %v148_v61, %s1873_s22  ;;  %v277_v61 = vld [vmem:[%s2856_s1 + $0x318] sm:$0xff] }
  0x9c   :  { %v1637_v8 = vpack.c.bf16 %v277_v61, %v276_v60  ;;  %v253_v60 = vld [vmem:[%s2856_s1 + $0x258] sm:$0xff] }
  0x9f   :  { %166 = vrot.lane.b32.xlu1 %v164_v62, %s1874_s23 }
  0xf0   :  { %v55_v63 = vpop.permute.xlu0 %54 }
  0xf1   :  { %v37_v0 = vpop.permute.xlu1 %36  ;;  %v56_v1 = vrot.slane %v55_v63, 2 }
  0xf2   :  { %v38_v2 = vrot.slane %v37_v0, 2 }
  0xf3   :  { %v58_v3 = vsel %vm57_vm2, %v55_v63, %v56_v1  ;;  %v1605_v63 = vpack.c.bf16 %v245_v50, %v244_v49  ;;  %v295_v1 = vld [vmem:[%s2856_s1 + $0x3a8] sm:$0xff]  ;;  %v269_v49 = vld [vmem:[%s2856_s1 + $0x2d8] sm:$0xff] }
  0xf4   :  { %v40_v4 = vsel %vm39_vm3, %v37_v0, %v38_v2  ;;  %60 = vst [vmem:[#allocation3 + $0x6] sm:$0x3] %v58_v3  ;;  %v73_v5 = vpop.permute.xlu0 %72  ;;  %v294_v0 = vld [vmem:[%s2856_s1 + $0x3a0] sm:$0xff]  ;;  %v1607_v3 = vpack.c.bf16 %v263_v56, %v262_v55  ;;  %v300_v56 = vld [vmem:[%s2856_s1 + $0x3d0] sm:$0xff] }
  0xf5   :  { %42 = vst [vmem:[#allocation3 + $0x2] sm:$0x3] %v40_v4  ;;  %v46_v6 = vpop.permute.xlu1 %45  ;;  %v74_v10 = vrot.slane %v73_v5, 2 }
  0xf6   :  { %v47_v11 = vrot.slane %v46_v6, 2 }
  0xf7   :  { %v76_v12 = vsel %vm75_vm4, %v73_v5, %v74_v10  ;;  %v246_v5 = vld [vmem:[%s2856_s1 + $0x220] sm:$0xff] }
  0xf8   :  { %v49_v13 = vsel %vm48_vm5, %v46_v6, %v47_v11  ;;  %78 = vst [vmem:[#allocation3 + $0xa] sm:$0x3] %v76_v12  ;;  %v91_v14 = vpop.permute.xlu0 %90  ;;  %v247_v6 = vld [vmem:[%s2856_s1 + $0x228] sm:$0xff]  ;;  %v264_v11 = vld [vmem:[%s2856_s1 + $0x2b0] sm:$0xff]  ;;  %v265_v12 = vld [vmem:[%s2856_s1 + $0x2b8] sm:$0xff] }
  0xf9   :  { %51 = vst [vmem:[#allocation3 + $0x4] sm:$0x3] %v49_v13  ;;  %v64_v15 = vpop.permute.xlu1 %63  ;;  %v92_v18 = vrot.slane %v91_v14, 2 }
  0xfa   :  { %v65_v19 = vrot.slane %v64_v15, 2 }
  0xfb   :  { %v94_v20 = vsel %vm93_vm6, %v91_v14, %v92_v18 }
  0xfc   :  { %v67_v21 = vsel %vm66_vm7, %v64_v15, %v65_v19  ;;  %96 = vst [vmem:[#allocation3 + $0xe] sm:$0x3] %v94_v20  ;;  %v111_v23 = vpop.permute.xlu0 %110  ;;  %v1639_v15 = vpack.c.bf16 %v295_v1, %v294_v0  ;;  %v271_v0 = vld [vmem:[%s2856_s1 + $0x2e8] sm:$0xff] }
  0xfd   :  { %69 = vst [vmem:[#allocation3 + $0x8] sm:$0x3] %v67_v21  ;;  %v82_v22 = vpop.permute.xlu1 %81  ;;  %v112_v26 = vrot.slane %v111_v23, 2  ;;  %v1609_v21 = vpack.c.bf16 %v247_v6, %v246_v5  ;;  %v302_v5 = vld [vmem:[%s2856_s1 + $0x3e0] sm:$0xff]  ;;  %v303_v6 = vld [vmem:[%s2856_s1 + $0x3e8] sm:$0xff] }
  0xfe   :  { %v83_v25 = vrot.slane %v82_v22, 2 }
  0xff   :  { %v113_v28 = vsel %vm39_vm3, %v111_v23, %v112_v26  ;;  %v296_v23 = vld [vmem:[%s2856_s1 + $0x3b0] sm:$0xff]  ;;  %v1611_v26 = vpack.c.bf16 %v265_v12, %v264_v11 }
 0x100   :  { %v85_v27 = vsel %vm84_vm8, %v82_v22, %v83_v25  ;;  %v173_v29 = vld [vmem:[#allocation3] sm:$0xff]  ;;  %115 = vst [vmem:[#allocation3 + $0x14] sm:$0x3] %v113_v28  ;;  %v127_v37 = vpop.permute.xlu0 %126  ;;  %v297_v25 = vld [vmem:[%s2856_s1 + $0x3b8] sm:$0xff]  ;;  %v272_v12 = vld [vmem:[%s2856_s1 + $0x2f0] sm:$0xff] }
 0x101   :  { %87 = vst [vmem:[#allocation3 + $0xc] sm:$0x3] %v85_v27  ;;  %v100_v32 = vpop.permute.xlu1 %99  ;;  %v478_v33 = vrot.slane %v173_v29, %v2125_v24  ;;  %v471_v34 = vcombine.high %v173_v29, %v173_v29  ;;  %v128_v41 = vrot.slane %v127_v37, 2  ;;  %v248_v27 = vld [vmem:[%s2856_s1 + $0x230] sm:$0xff]  ;;  %v249_v28 = vld [vmem:[%s2856_s1 + $0x238] sm:$0xff]  ;;  %v1643_v36 = vpack.c.bf16 %v297_v25, %v296_v23 }
 0x102   :  { %v101_v38 = vrot.slane %v100_v32, 2  ;;  %v1613_v40 = vpack.c.bf16 %v249_v28, %v248_v27  ;;  %v257_v23 = vld [vmem:[%s2856_s1 + $0x278] sm:$0xff]  ;;  %v322_v27 = vld [vmem:[%s2856_s1 + $0x480] sm:$0xff]  ;;  %v323_v28 = vld [vmem:[%s2856_s1 + $0x488] sm:$0xff] }
 0x103   :  { %v486_v42 = vcombine.high %v478_v33, %v478_v33  ;;  %v485_v44 = vrot.slane %v471_v34, %v2125_v24  ;;  %v129_v51 = vsel %vm57_vm2, %v127_v37, %v128_v41  ;;  %v267_v34 = vld [vmem:[%s2856_s1 + $0x2c8] sm:$0xff]  ;;  %v280_v37 = vld [vmem:[%s2856_s1 + $0x330] sm:$0xff]  ;;  %v298_v41 = vld [vmem:[%s2856_s1 + $0x3c0] sm:$0xff] }
 0x104   :  { %v103_v47 = vsel %vm102_vm9, %v100_v32, %v101_v38  ;;  %131 = vst [vmem:[#allocation3 + $0x18] sm:$0x3] %v129_v51  ;;  %v143_v57 = vpop.permute.xlu0 %142  ;;  %v1641_v32 = vpack.c.bf16 %v279_v17, %v278_v16  ;;  %v281_v38 = vld [vmem:[%s2856_s1 + $0x338] sm:$0xff]  ;;  %v287_v16 = vld [vmem:[%s2856_s1 + $0x368] sm:$0xff] }
 0x105   :  { %105 = vst [vmem:[#allocation3 + $0x10] sm:$0x3] %v103_v47  ;;  %v119_v52 = vpop.permute.xlu1 %118  ;;  %629 = vmatprep.mubr.f32.mxu0 %v486_v42  ;;  %v487_v53 = vcombine.high %v485_v44, %v485_v44  ;;  %v144_v62 = vrot.slane %v143_v57, 2  ;;  %v299_v42 = vld [vmem:[%s2856_s1 + $0x3c8] sm:$0xff]  ;;  %v1645_v47 = vpack.c.bf16 %v281_v38, %v280_v37  ;;  %v306_v37 = vld [vmem:[%s2856_s1 + $0x400] sm:$0xff] }
 0x106   :  { %v120_v58 = vrot.slane %v119_v52, 2  ;;  %630 = vmatmul.mubr.f32.vlgmr.msra.gmra.mrb[0].mxu0 %v478_v33  ;;  %v266_v33 = vld [vmem:[%s2856_s1 + $0x2c0] sm:$0xff]  ;;  %v1647_v51 = vpack.c.bf16 %v299_v42, %v298_v41  ;;  %v307_v38 = vld [vmem:[%s2856_s1 + $0x408] sm:$0xff]  ;;  %v324_v41 = vld [vmem:[%s2856_s1 + $0x490] sm:$0xff] }
 0x107   :  { %1602 = vmatpush3.bf16.msra.mxu0 %v1601_v43  ;;  %699 = vmatprep.mubr.f32.mxu1 %v487_v53  ;;  %v145_v7 = vsel %vm75_vm4, %v143_v57, %v144_v62  ;;  %v1615_v43 = vpack.c.bf16 %v267_v34, %v266_v33  ;;  %v283_v53 = vld [vmem:[%s2856_s1 + $0x348] sm:$0xff]  ;;  %v301_v57 = vld [vmem:[%s2856_s1 + $0x3d8] sm:$0xff]  ;;  %v354_v33 = vld [vmem:[%s2856_s1 + $0x580] sm:$0xff] }
 0x108   :  { %v121_v2 = vsel %vm48_vm5, %v119_v52, %v120_v58  ;;  %700 = vmatmul.mubr.f32.vlgmr.msra.gmra.mrb[0].mxu1 %v485_v44  ;;  %1604 = vmatprep.subr.bf16.mxu0 %v1603_v48  ;;  %v174_v4 = vld [vmem:[#allocation3 + $0x8] sm:$0xff]  ;;  %147 = vst [vmem:[#allocation3 + $0x1c] sm:$0x3] %v145_v7  ;;  %v159_v14 = vpop.permute.xlu0 %158  ;;  %v250_v44 = vld [vmem:[%s2856_s1 + $0x240] sm:$0xff]  ;;  %v1651_v1 = vpack.c.bf16 %v301_v57, %v300_v56  ;;  %v355_v34 = vld [vmem:[%s2856_s1 + $0x588] sm:$0xff] }
 0x109   :  { %123 = vst [vmem:[#allocation3 + $0x16] sm:$0x3] %v121_v2  ;;  %1634 = vmatpush3.bf16.msra.mxu1 %v1633_v54  ;;  %v2190_v9 = vrot.slane %v174_v4, %v2125_v24  ;;  %v488_v10 = vcombine.high %v174_v4, %v174_v4  ;;  %v135_v13 = vpop.permute.xlu1 %134  ;;  %v160_v19 = vrot.slane %v159_v14, 2  ;;  %v268_v48 = vld [vmem:[%s2856_s1 + $0x2d0] sm:$0xff]  ;;  %v282_v52 = vld [vmem:[%s2856_s1 + $0x340] sm:$0xff]  ;;  %v1617_v55 = vpack.c.bf16 %v251_v45, %v250_v44  ;;  %v325_v42 = vld [vmem:[%s2856_s1 + $0x498] sm:$0xff] }
 0x10a   :  { %1636 = vmatprep.subr.bf16.mxu1 %v1635_v59  ;;  %v136_v18 = vrot.slane %v135_v13, 2  ;;  %v1619_v58 = vpack.c.bf16 %v269_v49, %v268_v48  ;;  %v252_v59 = vld [vmem:[%s2856_s1 + $0x250] sm:$0xff]  ;;  %v1649_v62 = vpack.c.bf16 %v283_v53, %v282_v52  ;;  %v338_v44 = vld [vmem:[%s2856_s1 + $0x500] sm:$0xff]  ;;  %v339_v45 = vld [vmem:[%s2856_s1 + $0x508] sm:$0xff] }
 0x10b   :  { %1606 = vmatpush3.bf16.msra.mxu0 %v1605_v63  ;;  %v503_v20 = vcombine.high %v2190_v9, %v2190_v9  ;;  %v2207_v22 = vrot.slane %v488_v10, %v2125_v24  ;;  %v161_v30 = vsel %vm93_vm6, %v159_v14, %v160_v19  ;;  %v270_v63 = vld [vmem:[%s2856_s1 + $0x2e0] sm:$0xff]  ;;  %v284_v2 = vld [vmem:[%s2856_s1 + $0x350] sm:$0xff]  ;;  %v1621_v4 = vpack.c.bf16 %v253_v60, %v252_v59  ;;  %v255_v10 = vld [vmem:[%s2856_s1 + $0x268] sm:$0xff] }
 0x10c   :  { %1608 = vmatprep.subr.bf16.mxu0 %v1607_v3  ;;  %v137_v29 = vsel %vm66_vm7, %v135_v13, %v136_v18  ;;  %163 = vst [vmem:[#allocation3 + $0x20] sm:$0x3] %v161_v30  ;;  %v285_v3 = vld [vmem:[%s2856_s1 + $0x358] sm:$0xff]  ;;  %v1623_v7 = vpack.c.bf16 %v271_v0, %v270_v63  ;;  %v1655_v14 = vpack.c.bf16 %v303_v6, %v302_v5  ;;  %v304_v18 = vld [vmem:[%s2856_s1 + $0x3f0] sm:$0xff]  ;;  %v327_v56 = vld [vmem:[%s2856_s1 + $0x4a8] sm:$0xff] }
 0x10d   :  { %1638 = vmatpush3.bf16.msra.mxu1 %v1637_v8  ;;  %769 = vmatprep.mubr.f32.mxu0 %v503_v20  ;;  %v504_v31 = vcombine.high %v2207_v22, %v2207_v22  ;;  %139 = vst [vmem:[#allocation3 + $0x1a] sm:$0x3] %v137_v29  ;;  %v151_v35 = vpop.permute.xlu1 %150  ;;  %v254_v8 = vld [vmem:[%s2856_s1 + $0x260] sm:$0xff]  ;;  %v1653_v11 = vpack.c.bf16 %v285_v3, %v284_v2  ;;  %v273_v13 = vld [vmem:[%s2856_s1 + $0x2f8] sm:$0xff]  ;;  %v288_v30 = vld [vmem:[%s2856_s1 + $0x370] sm:$0xff] }
 0x10e   :  { %1640 = vmatprep.subr.bf16.mxu1 %v1639_v15  ;;  %v152_v39 = vrot.slane %v151_v35, 2  ;;  %v286_v15 = vld [vmem:[%s2856_s1 + $0x360] sm:$0xff]  ;;  %v1625_v17 = vpack.c.bf16 %v255_v10, %v254_v8  ;;  %v305_v19 = vld [vmem:[%s2856_s1 + $0x3f8] sm:$0xff]  ;;  %v1627_v20 = vpack.c.bf16 %v273_v13, %v272_v12  ;;  %v356_v48 = vld [vmem:[%s2856_s1 + $0x590] sm:$0xff] }
 0x10f   :  { %1610 = vmatpush3.bf16.msra.mxu0 %v1609_v21  ;;  %839 = vmatprep.mubr.f32.mxu1 %v504_v31  ;;  %v256_v21 = vld [vmem:[%s2856_s1 + $0x270] sm:$0xff]  ;;  %v1659_v29 = vpack.c.bf16 %v305_v19, %v304_v18  ;;  %v289_v31 = vld [vmem:[%s2856_s1 + $0x378] sm:$0xff]  ;;  %v310_v0 = vld [vmem:[%s2856_s1 + $0x420] sm:$0xff] }
 0x110   :  { %1612 = vmatprep.subr.bf16.mxu0 %v1611_v26  ;;  %v153_v46 = vsel %vm84_vm8, %v151_v35, %v152_v39  ;;  %v175_v25 = vld [vmem:[#allocation3 + $0x10] sm:$0xff]  ;;  %v1657_v26 = vpack.c.bf16 %v287_v16, %v286_v15  ;;  %v1661_v39 = vpack.c.bf16 %v289_v31, %v288_v30  ;;  %v328_v3 = vld [vmem:[%s2856_s1 + $0x4b0] sm:$0xff]  ;;  %v342_v5 = vld [vmem:[%s2856_s1 + $0x520] sm:$0xff] }
 0x111   :  { %1642 = vmatpush3.bf16.msra.mxu1 %v1641_v32  ;;  %155 = vst [vmem:[#allocation3 + $0x1e] sm:$0x3] %v153_v46  ;;  %v167_v50 = vpop.permute.xlu1 %166  ;;  %v1629_v32 = vpack.c.bf16 %v257_v23, %v256_v21  ;;  %v505_v35 = vcombine.high %v175_v25, %v175_v25  ;;  %v1665_v46 = vpack.c.bf16 %v307_v38, %v306_v37  ;;  %v357_v49 = vld [vmem:[%s2856_s1 + $0x598] sm:$0xff]  ;;  %v343_v6 = vld [vmem:[%s2856_s1 + $0x528] sm:$0xff]  ;;  %v360_v8 = vld [vmem:[%s2856_s1 + $0x5b0] sm:$0xff] }
 0x112   :  { %1644 = vmatprep.subr.bf16.mxu1 %v1643_v36  ;;  %v168_v54 = vrot.slane %v167_v50, 2  ;;  %v1663_v36 = vpack.c.bf16 %v323_v28, %v322_v27  ;;  %v309_v52 = vld [vmem:[%s2856_s1 + $0x418] sm:$0xff]  ;;  %v1699_v57 = vpack.c.bf16 %v357_v49, %v356_v48  ;;  %v312_v12 = vld [vmem:[%s2856_s1 + $0x430] sm:$0xff]  ;;  %v330_v15 = vld [vmem:[%s2856_s1 + $0x4c0] sm:$0xff] }
 0x113   :  { %1614 = vmatpush3.bf16.msra.mxu0 %v1613_v40  ;;  %v2348_v40 = vrot.slane %v175_v25, %v2125_v24  ;;  %v341_v59 = vld [vmem:[%s2856_s1 + $0x518] sm:$0xff]  ;;  %v331_v16 = vld [vmem:[%s2856_s1 + $0x4c8] sm:$0xff]  ;;  %v344_v18 = vld [vmem:[%s2856_s1 + $0x530] sm:$0xff] }
 0x114   :  { %1616 = vmatprep.subr.bf16.mxu0 %v1615_v43  ;;  %v169_v61 = vsel %vm102_vm9, %v167_v50, %v168_v54  ;;  %v1695_v43 = vpack.c.bf16 %v355_v34, %v354_v33  ;;  %v1667_v50 = vpack.c.bf16 %v325_v42, %v324_v41  ;;  %v1697_v54 = vpack.c.bf16 %v339_v45, %v338_v44  ;;  %v361_v10 = vld [vmem:[%s2856_s1 + $0x5b8] sm:$0xff]  ;;  %v362_v21 = vld [vmem:[%s2856_s1 + $0x5c0] sm:$0xff]  ;;  %v363_v23 = vld [vmem:[%s2856_s1 + $0x5c8] sm:$0xff] }
 0x115   :  { %1646 = vmatpush3.bf16.msra.mxu1 %v1645_v47  ;;  %171 = vst [vmem:[#allocation3 + $0x22] sm:$0x3] %v169_v61  ;;  %v2363_v47 = vrot.slane %v505_v35, %v2125_v24  ;;  %v520_v53 = vcombine.high %v2348_v40, %v2348_v40  ;;  %v313_v13 = vld [vmem:[%s2856_s1 + $0x438] sm:$0xff]  ;;  %v1679_v25 = vpack.c.bf16 %v331_v16, %v330_v15  ;;  %v315_v27 = vld [vmem:[%s2856_s1 + $0x448] sm:$0xff]  ;;  %v364_v35 = vld [vmem:[%s2856_s1 + $0x5d0] sm:$0xff] }
 0x116   :  { %1648 = vmatprep.subr.bf16.mxu1 %v1647_v51  ;;  %v308_v51 = vld [vmem:[%s2856_s1 + $0x410] sm:$0xff]  ;;  %v345_v19 = vld [vmem:[%s2856_s1 + $0x538] sm:$0xff]  ;;  %v1711_v31 = vpack.c.bf16 %v363_v23, %v362_v21  ;;  %v347_v33 = vld [vmem:[%s2856_s1 + $0x548] sm:$0xff] }
 0x117   :  { %1618 = vmatpush3.bf16.msra.mxu0 %v1617_v55  ;;  %v326_v55 = vld [vmem:[%s2856_s1 + $0x4a0] sm:$0xff]  ;;  %v521_v60 = vcombine.high %v2363_v47, %v2363_v47  ;;  %v1669_v61 = vpack.c.bf16 %v309_v52, %v308_v51  ;;  %v1709_v28 = vpack.c.bf16 %v345_v19, %v344_v18  ;;  %v333_v30 = vld [vmem:[%s2856_s1 + $0x4d8] sm:$0xff]  ;;  %v316_v38 = vld [vmem:[%s2856_s1 + $0x450] sm:$0xff] }
 0x118   :  { %1620 = vmatprep.subr.bf16.mxu0 %v1619_v58  ;;  %v340_v58 = vld [vmem:[%s2856_s1 + $0x510] sm:$0xff]  ;;  %v1671_v63 = vpack.c.bf16 %v327_v56, %v326_v55  ;;  %v334_v42 = vld [vmem:[%s2856_s1 + $0x4e0] sm:$0xff]  ;;  %v337_v56 = vld [vmem:[%s2856_s1 + $0x4f8] sm:$0xff] }
 0x119   :  { %1650 = vmatpush3.bf16.msra.mxu1 %v1649_v62  ;;  %v359_v62 = vld [vmem:[%s2856_s1 + $0x5a8] sm:$0xff]  ;;  %v1701_v2 = vpack.c.bf16 %v341_v59, %v340_v58  ;;  %v348_v45 = vld [vmem:[%s2856_s1 + $0x550] sm:$0xff]  ;;  %v366_v49 = vld [vmem:[%s2856_s1 + $0x5e0] sm:$0xff] }
 0x11a   :  { %1652 = vmatprep.subr.bf16.mxu1 %v1651_v1  ;;  %v311_v1 = vld [vmem:[%s2856_s1 + $0x428] sm:$0xff]  ;;  %v318_v52 = vld [vmem:[%s2856_s1 + $0x460] sm:$0xff]  ;;  %v336_v55 = vld [vmem:[%s2856_s1 + $0x4f0] sm:$0xff] }
 0x11b   :  { %1622 = vmatpush3.bf16.msra.mxu0 %v1621_v4  ;;  %v350_v58 = vld [vmem:[%s2856_s1 + $0x560] sm:$0xff]  ;;  %v351_v59 = vld [vmem:[%s2856_s1 + $0x568] sm:$0xff]  ;;  %v389_v18 = vld [vmem:[%s2856_s1 + $0x698] sm:$0xff] }
 0x11c   :  { %1624 = vmatprep.subr.bf16.mxu0 %v1623_v7  ;;  %v1673_v7 = vpack.c.bf16 %v311_v1, %v310_v0  ;;  %v321_v0 = vld [vmem:[%s2856_s1 + $0x478] sm:$0xff]  ;;  %v176_v1 = vld [vmem:[#allocation3 + $0x18] sm:$0xff]  ;;  %v403_v21 = vld [vmem:[%s2856_s1 + $0x708] sm:$0xff] }
 0x11d   :  { %1654 = vmatpush3.bf16.msra.mxu1 %v1653_v11  ;;  %v2552_v16 = vrot.slane %v176_v1, %v2125_v24 }
 0x11e   :  { %1656 = vmatprep.subr.bf16.mxu1 %v1655_v14  ;;  %v1705_v14 = vpack.c.bf16 %v343_v6, %v342_v5  ;;  %v352_v5 = vld [vmem:[%s2856_s1 + $0x570] sm:$0xff]  ;;  %v353_v6 = vld [vmem:[%s2856_s1 + $0x578] sm:$0xff] }
 0x11f   :  { %1626 = vmatpush3.bf16.msra.mxu0 %v1625_v17  ;;  %v1707_v17 = vpack.c.bf16 %v361_v10, %v360_v8  ;;  %v418_v8 = vld [vmem:[%s2856_s1 + $0x780] sm:$0xff]  ;;  %v419_v10 = vld [vmem:[%s2856_s1 + $0x788] sm:$0xff]  ;;  %v1725_v15 = vpack.c.bf16 %v353_v6, %v352_v5 }
 0x120   :  { %1628 = vmatprep.subr.bf16.mxu0 %v1627_v20  ;;  %v1677_v20 = vpack.c.bf16 %v313_v13, %v312_v12  ;;  %v370_v13 = vld [vmem:[%s2856_s1 + $0x600] sm:$0xff]  ;;  %v1759_v19 = vpack.c.bf16 %v419_v10, %v418_v8  ;;  %v428_v10 = vld [vmem:[%s2856_s1 + $0x7d0] sm:$0xff] }
 0x121   :  { %1658 = vmatpush3.bf16.msra.mxu1 %v1657_v26  ;;  %v314_v26 = vld [vmem:[%s2856_s1 + $0x440] sm:$0xff] }
 0x122   :  { %1660 = vmatprep.subr.bf16.mxu1 %v1659_v29  ;;  %v332_v29 = vld [vmem:[%s2856_s1 + $0x4d0] sm:$0xff]  ;;  %v1681_v34 = vpack.c.bf16 %v315_v27, %v314_v26  ;;  %v421_v27 = vld [vmem:[%s2856_s1 + $0x798] sm:$0xff]  ;;  %v410_v6 = vld [vmem:[%s2856_s1 + $0x740] sm:$0xff] }
 0x123   :  { %1630 = vmatpush3.bf16.msra.mxu0 %v1629_v32  ;;  %v346_v32 = vld [vmem:[%s2856_s1 + $0x540] sm:$0xff]  ;;  %v1683_v37 = vpack.c.bf16 %v333_v30, %v332_v29  ;;  %v420_v26 = vld [vmem:[%s2856_s1 + $0x790] sm:$0xff]  ;;  %v373_v30 = vld [vmem:[%s2856_s1 + $0x618] sm:$0xff] }
 0x124   :  { %1664 = vmatprep.subr.bf16.mxu0 %v1663_v36  ;;  %v365_v36 = vld [vmem:[%s2856_s1 + $0x5d8] sm:$0xff]  ;;  %v1713_v41 = vpack.c.bf16 %v347_v33, %v346_v32  ;;  %v372_v29 = vld [vmem:[%s2856_s1 + $0x610] sm:$0xff]  ;;  %v390_v32 = vld [vmem:[%s2856_s1 + $0x6a0] sm:$0xff] }
 0x125   :  { %1662 = vmatpush3.bf16.msra.mxu1 %v1661_v39  ;;  %v317_v39 = vld [vmem:[%s2856_s1 + $0x458] sm:$0xff]  ;;  %v1715_v44 = vpack.c.bf16 %v365_v36, %v364_v35  ;;  %v391_v33 = vld [vmem:[%s2856_s1 + $0x6a8] sm:$0xff]  ;;  %v404_v35 = vld [vmem:[%s2856_s1 + $0x710] sm:$0xff] }
 0x126   :  { %770 = vmatmul.mubr.f32.vlgmr.msra.gmra.mrb[2].mxu0 %v2190_v9  ;;  %1696 = vmatprep.subr.bf16.mxu1 %v1695_v43  ;;  %v358_v9 = vld [vmem:[%s2856_s1 + $0x5a0] sm:$0xff]  ;;  %v335_v43 = vld [vmem:[%s2856_s1 + $0x4e8] sm:$0xff]  ;;  %v1685_v48 = vpack.c.bf16 %v317_v39, %v316_v38  ;;  %v405_v36 = vld [vmem:[%s2856_s1 + $0x718] sm:$0xff]  ;;  %v1733_v38 = vpack.c.bf16 %v373_v30, %v372_v29 }
 0x127   :  { %1666 = vmatpush3.bf16.msra.mxu0 %v1665_v46  ;;  %909 = vmatprep.mubr.f32.mxu0 %v520_v53  ;;  %v1703_v4 = vpack.c.bf16 %v359_v62, %v358_v9  ;;  %v349_v46 = vld [vmem:[%s2856_s1 + $0x558] sm:$0xff]  ;;  %v1687_v51 = vpack.c.bf16 %v335_v43, %v334_v42  ;;  %v319_v53 = vld [vmem:[%s2856_s1 + $0x468] sm:$0xff]  ;;  %v1691_v62 = vpack.c.bf16 %v337_v56, %v336_v55  ;;  %v374_v42 = vld [vmem:[%s2856_s1 + $0x620] sm:$0xff] }
 0x128   :  { %840 = vmatmul.mubr.f32.vlgmr.msra.gmra.mrb[2].mxu1 %v2207_v22  ;;  %1668 = vmatprep.subr.bf16.mxu0 %v1667_v50  ;;  %v329_v22 = vld [vmem:[%s2856_s1 + $0x4b8] sm:$0xff]  ;;  %v367_v50 = vld [vmem:[%s2856_s1 + $0x5e8] sm:$0xff]  ;;  %v382_v29 = vld [vmem:[%s2856_s1 + $0x660] sm:$0xff] }
 0x129   :  { %1698 = vmatpush3.bf16.msra.mxu1 %v1697_v54  ;;  %979 = vmatprep.mubr.f32.mxu1 %v521_v60  ;;  %v1675_v11 = vpack.c.bf16 %v329_v22, %v328_v3  ;;  %v1717_v54 = vpack.c.bf16 %v349_v46, %v348_v45  ;;  %v1689_v60 = vpack.c.bf16 %v319_v53, %v318_v52  ;;  %v369_v9 = vld [vmem:[%s2856_s1 + $0x5f8] sm:$0xff]  ;;  %v386_v3 = vld [vmem:[%s2856_s1 + $0x680] sm:$0xff]  ;;  %v387_v22 = vld [vmem:[%s2856_s1 + $0x688] sm:$0xff] }
 0x12a   :  { %1700 = vmatprep.subr.bf16.mxu1 %v1699_v57  ;;  %v1719_v57 = vpack.c.bf16 %v367_v50, %v366_v49  ;;  %v1727_v12 = vpack.c.bf16 %v387_v22, %v386_v3  ;;  %v423_v39 = vld [vmem:[%s2856_s1 + $0x7a8] sm:$0xff]  ;;  %v392_v45 = vld [vmem:[%s2856_s1 + $0x6b0] sm:$0xff]  ;;  %v425_v52 = vld [vmem:[%s2856_s1 + $0x7b8] sm:$0xff] }
 0x12b   :  { %1670 = vmatpush3.bf16.msra.mxu0 %v1669_v61  ;;  %v368_v61 = vld [vmem:[%s2856_s1 + $0x5f0] sm:$0xff]  ;;  %v375_v43 = vld [vmem:[%s2856_s1 + $0x628] sm:$0xff]  ;;  %v377_v55 = vld [vmem:[%s2856_s1 + $0x638] sm:$0xff] }
 0x12c   :  { %1672 = vmatprep.subr.bf16.mxu0 %v1671_v63  ;;  %v320_v63 = vld [vmem:[%s2856_s1 + $0x470] sm:$0xff]  ;;  %v407_v49 = vld [vmem:[%s2856_s1 + $0x728] sm:$0xff]  ;;  %v1737_v50 = vpack.c.bf16 %v375_v43, %v374_v42  ;;  %v450_v43 = vld [vmem:[%s2856_s1 + $0x880] sm:$0xff] }
 0x12d   :  { %1702 = vmatpush3.bf16.msra.mxu1 %v1701_v2  ;;  %v1721_v2 = vpack.c.bf16 %v351_v59, %v350_v58  ;;  %v395_v58 = vld [vmem:[%s2856_s1 + $0x6c8] sm:$0xff]  ;;  %v396_v22 = vld [vmem:[%s2856_s1 + $0x6d0] sm:$0xff] }
 0x12e   :  { %1704 = vmatprep.subr.bf16.mxu1 %v1703_v4  ;;  %v1723_v4 = vpack.c.bf16 %v369_v9, %v368_v61  ;;  %v409_v61 = vld [vmem:[%s2856_s1 + $0x738] sm:$0xff]  ;;  %v383_v30 = vld [vmem:[%s2856_s1 + $0x668] sm:$0xff] }
 0x12f   :  { %1674 = vmatpush3.bf16.msra.mxu0 %v1673_v7  ;;  %v1693_v7 = vpack.c.bf16 %v321_v0, %v320_v63  ;;  %v427_v63 = vld [vmem:[%s2856_s1 + $0x7c8] sm:$0xff] }
 0x130   :  { %1676 = vmatprep.subr.bf16.mxu0 %v1675_v11  ;;  %v522_v11 = vcombine.high %v176_v1, %v176_v1  ;;  %v378_v1 = vld [vmem:[%s2856_s1 + $0x640] sm:$0xff] }
 0x131   :  { %1706 = vmatpush3.bf16.msra.mxu1 %v1705_v14  ;;  %v371_v14 = vld [vmem:[%s2856_s1 + $0x608] sm:$0xff] }
 0x132   :  { %1708 = vmatprep.subr.bf16.mxu1 %v1707_v17  ;;  %v388_v17 = vld [vmem:[%s2856_s1 + $0x690] sm:$0xff]  ;;  %v1729_v23 = vpack.c.bf16 %v371_v14, %v370_v13  ;;  %v381_v14 = vld [vmem:[%s2856_s1 + $0x658] sm:$0xff] }
 0x133   :  { %1678 = vmatpush3.bf16.msra.mxu0 %v1677_v20  ;;  %v402_v20 = vld [vmem:[%s2856_s1 + $0x700] sm:$0xff]  ;;  %v380_v13 = vld [vmem:[%s2856_s1 + $0x650] sm:$0xff] }
 0x134   :  { %1680 = vmatprep.subr.bf16.mxu0 %v1679_v25  ;;  %v2567_v25 = vrot.slane %v522_v11, %v2125_v24  ;;  %v537_v24 = vcombine.high %v2552_v16, %v2552_v16  ;;  %v429_v11 = vld [vmem:[%s2856_s1 + $0x7d8] sm:$0xff] }
 0x135   :  { %1710 = vmatpush3.bf16.msra.mxu1 %v1709_v28  ;;  %v1731_v28 = vpack.c.bf16 %v389_v18, %v388_v17  ;;  %v398_v17 = vld [vmem:[%s2856_s1 + $0x6e0] sm:$0xff]  ;;  %v399_v18 = vld [vmem:[%s2856_s1 + $0x6e8] sm:$0xff] }
 0x136   :  { %1712 = vmatprep.subr.bf16.mxu1 %v1711_v31  ;;  %v1761_v31 = vpack.c.bf16 %v403_v21, %v402_v20  ;;  %v412_v20 = vld [vmem:[%s2856_s1 + $0x750] sm:$0xff]  ;;  %v413_v21 = vld [vmem:[%s2856_s1 + $0x758] sm:$0xff] }
 0x137   :  { %1682 = vmatpush3.bf16.msra.mxu0 %v1681_v34  ;;  %v1763_v34 = vpack.c.bf16 %v421_v27, %v420_v26  ;;  %v430_v26 = vld [vmem:[%s2856_s1 + $0x7e0] sm:$0xff]  ;;  %v431_v27 = vld [vmem:[%s2856_s1 + $0x7e8] sm:$0xff] }
 0x138   :  { %1684 = vmatprep.subr.bf16.mxu0 %v1683_v37  ;;  %v538_v37 = vcombine.high %v2567_v25, %v2567_v25 }
 0x139   :  { %1714 = vmatpush3.bf16.msra.mxu1 %v1713_v41  ;;  %v1735_v41 = vpack.c.bf16 %v391_v33, %v390_v32  ;;  %v401_v32 = vld [vmem:[%s2856_s1 + $0x6f8] sm:$0xff]  ;;  %v1783_v33 = vpack.c.bf16 %v431_v27, %v430_v26  ;;  %v446_v26 = vld [vmem:[%s2856_s1 + $0x860] sm:$0xff]  ;;  %v447_v27 = vld [vmem:[%s2856_s1 + $0x868] sm:$0xff] }
 0x13a   :  { %1716 = vmatprep.subr.bf16.mxu1 %v1715_v44  ;;  %v1765_v44 = vpack.c.bf16 %v405_v36, %v404_v35  ;;  %v415_v35 = vld [vmem:[%s2856_s1 + $0x768] sm:$0xff]  ;;  %v1753_v36 = vpack.c.bf16 %v383_v30, %v382_v29  ;;  %v465_v29 = vld [vmem:[%s2856_s1 + $0x8f8] sm:$0xff]  ;;  %v1817_v30 = vpack.c.bf16 %v447_v27, %v446_v26 }
 0x13b   :  { %1686 = vmatpush3.bf16.msra.mxu0 %v1685_v48  ;;  %v406_v48 = vld [vmem:[%s2856_s1 + $0x720] sm:$0xff] }
 0x13c   :  { %1688 = vmatprep.subr.bf16.mxu0 %v1687_v51  ;;  %v424_v51 = vld [vmem:[%s2856_s1 + $0x7b0] sm:$0xff]  ;;  %v1769_v56 = vpack.c.bf16 %v407_v49, %v406_v48 }
 0x13d   :  { %1718 = vmatpush3.bf16.msra.mxu1 %v1717_v54  ;;  %v376_v54 = vld [vmem:[%s2856_s1 + $0x630] sm:$0xff]  ;;  %v1771_v59 = vpack.c.bf16 %v425_v52, %v424_v51  ;;  %v435_v51 = vld [vmem:[%s2856_s1 + $0x808] sm:$0xff] }
 0x13e   :  { %1720 = vmatprep.subr.bf16.mxu1 %v1719_v57  ;;  %v394_v57 = vld [vmem:[%s2856_s1 + $0x6c0] sm:$0xff]  ;;  %v1741_v9 = vpack.c.bf16 %v377_v55, %v376_v54  ;;  %v453_v54 = vld [vmem:[%s2856_s1 + $0x898] sm:$0xff]  ;;  %v2755_v55 = vld.sshfl [vmem:[#allocation3 + $0x20] sm:$0x33 pattern:$0x76325410] }
 0x13f   :  { %1690 = vmatpush3.bf16.msra.mxu0 %v1689_v60  ;;  %v408_v60 = vld [vmem:[%s2856_s1 + $0x730] sm:$0xff]  ;;  %v1743_v0 = vpack.c.bf16 %v395_v58, %v394_v57 }
 0x140   :  { %1692 = vmatprep.subr.bf16.mxu0 %v1691_v62  ;;  %v426_v62 = vld [vmem:[%s2856_s1 + $0x7c0] sm:$0xff]  ;;  %v1773_v3 = vpack.c.bf16 %v409_v61, %v408_v60  ;;  %v436_v58 = vld [vmem:[%s2856_s1 + $0x810] sm:$0xff]  ;;  %v546_v60 = vcombine.high %v2755_v55, %v2755_v55 }
 0x141   :  { %1722 = vmatpush3.bf16.msra.mxu1 %v1721_v2  ;;  %v379_v2 = vld [vmem:[%s2856_s1 + $0x648] sm:$0xff]  ;;  %v1775_v5 = vpack.c.bf16 %v427_v63, %v426_v62  ;;  %v454_v61 = vld [vmem:[%s2856_s1 + $0x8a0] sm:$0xff] }
 0x142   :  { %1724 = vmatprep.subr.bf16.mxu1 %v1723_v4  ;;  %v397_v4 = vld [vmem:[%s2856_s1 + $0x6d8] sm:$0xff]  ;;  %v1745_v8 = vpack.c.bf16 %v379_v2, %v378_v1  ;;  %v439_v1 = vld [vmem:[%s2856_s1 + $0x828] sm:$0xff]  ;;  %v456_v2 = vld [vmem:[%s2856_s1 + $0x8b0] sm:$0xff] }
 0x143   :  { %1694 = vmatpush3.bf16.msra.mxu0 %v1693_v7  ;;  %v411_v7 = vld [vmem:[%s2856_s1 + $0x748] sm:$0xff] }
 0x144   :  { %1728 = vmatprep.subr.bf16.mxu0 %v1727_v12  ;;  %v1747_v12 = vpack.c.bf16 %v397_v4, %v396_v22  ;;  %v440_v22 = vld [vmem:[%s2856_s1 + $0x830] sm:$0xff]  ;;  %v441_v4 = vld [vmem:[%s2856_s1 + $0x838] sm:$0xff] }
 0x145   :  { %1726 = vmatpush3.bf16.msra.mxu1 %v1725_v15  ;;  %v1777_v15 = vpack.c.bf16 %v411_v7, %v410_v6  ;;  %v459_v6 = vld [vmem:[%s2856_s1 + $0x8c8] sm:$0xff]  ;;  %v1805_v7 = vpack.c.bf16 %v441_v4, %v440_v22 }
 0x146   :  { %910 = vmatmul.mubr.f32.vlgmr.msra.gmra.mrb[4].mxu0 %v2348_v40  ;;  %1760 = vmatprep.subr.bf16.mxu1 %v1759_v19  ;;  %v422_v40 = vld [vmem:[%s2856_s1 + $0x7a0] sm:$0xff]  ;;  %v1779_v19 = vpack.c.bf16 %v429_v11, %v428_v10  ;;  %v443_v11 = vld [vmem:[%s2856_s1 + $0x848] sm:$0xff] }
 0x147   :  { %1730 = vmatpush3.bf16.msra.mxu0 %v1729_v23  ;;  %1049 = vmatprep.mubr.f32.mxu0 %v537_v24  ;;  %v1767_v46 = vpack.c.bf16 %v423_v39, %v422_v40  ;;  %v1749_v23 = vpack.c.bf16 %v381_v14, %v380_v13  ;;  %v1781_v24 = vpack.c.bf16 %v413_v21, %v412_v20  ;;  %v384_v39 = vld [vmem:[%s2856_s1 + $0x670] sm:$0xff]  ;;  %v442_v10 = vld [vmem:[%s2856_s1 + $0x840] sm:$0xff]  ;;  %v461_v13 = vld [vmem:[%s2856_s1 + $0x8d8] sm:$0xff] }
 0x148   :  { %980 = vmatmul.mubr.f32.vlgmr.msra.gmra.mrb[4].mxu1 %v2363_v47  ;;  %1732 = vmatprep.subr.bf16.mxu0 %v1731_v28  ;;  %v393_v47 = vld [vmem:[%s2856_s1 + $0x6b8] sm:$0xff]  ;;  %v1751_v28 = vpack.c.bf16 %v399_v18, %v398_v17  ;;  %v1809_v14 = vpack.c.bf16 %v443_v11, %v442_v10  ;;  %v444_v17 = vld [vmem:[%s2856_s1 + $0x850] sm:$0xff]  ;;  %v463_v20 = vld [vmem:[%s2856_s1 + $0x8e8] sm:$0xff] }
 0x149   :  { %1762 = vmatpush3.bf16.msra.mxu1 %v1761_v31  ;;  %1119 = vmatprep.mubr.f32.mxu1 %v538_v37  ;;  %v1739_v53 = vpack.c.bf16 %v393_v47, %v392_v45  ;;  %v400_v31 = vld [vmem:[%s2856_s1 + $0x6f0] sm:$0xff]  ;;  %v445_v18 = vld [vmem:[%s2856_s1 + $0x858] sm:$0xff] }
 0x14a   :  { %1764 = vmatprep.subr.bf16.mxu1 %v1763_v34  ;;  %v414_v34 = vld [vmem:[%s2856_s1 + $0x760] sm:$0xff]  ;;  %v432_v37 = vld [vmem:[%s2856_s1 + $0x7f0] sm:$0xff]  ;;  %v1755_v40 = vpack.c.bf16 %v401_v32, %v400_v31  ;;  %v1813_v21 = vpack.c.bf16 %v445_v18, %v444_v17  ;;  %v449_v32 = vld [vmem:[%s2856_s1 + $0x878] sm:$0xff] }
 0x14b   :  { %1734 = vmatpush3.bf16.msra.mxu0 %v1733_v38  ;;  %v433_v38 = vld [vmem:[%s2856_s1 + $0x7f8] sm:$0xff]  ;;  %v1785_v42 = vpack.c.bf16 %v415_v35, %v414_v34  ;;  %v416_v47 = vld [vmem:[%s2856_s1 + $0x770] sm:$0xff] }
 0x14c   :  { %1736 = vmatprep.subr.bf16.mxu0 %v1735_v41  ;;  %v385_v41 = vld [vmem:[%s2856_s1 + $0x678] sm:$0xff]  ;;  %v1787_v45 = vpack.c.bf16 %v433_v38, %v432_v37  ;;  %v448_v31 = vld [vmem:[%s2856_s1 + $0x870] sm:$0xff] }
 0x14d   :  { %1766 = vmatpush3.bf16.msra.mxu1 %v1765_v44  ;;  %v451_v44 = vld [vmem:[%s2856_s1 + $0x888] sm:$0xff]  ;;  %v1757_v48 = vpack.c.bf16 %v385_v41, %v384_v39 }
 0x14e   :  { %1768 = vmatprep.subr.bf16.mxu1 %v1767_v46  ;;  %v417_v46 = vld [vmem:[%s2856_s1 + $0x778] sm:$0xff]  ;;  %v1791_v49 = vpack.c.bf16 %v451_v44, %v450_v43 }
 0x14f   :  { %1738 = vmatpush3.bf16.msra.mxu0 %v1737_v50  ;;  %v434_v50 = vld [vmem:[%s2856_s1 + $0x800] sm:$0xff]  ;;  %v1789_v52 = vpack.c.bf16 %v417_v46, %v416_v47 }
 0x150   :  { %1740 = vmatprep.subr.bf16.mxu0 %v1739_v53  ;;  %v452_v53 = vld [vmem:[%s2856_s1 + $0x890] sm:$0xff] }
 0x151   :  { %1770 = vmatpush3.bf16.msra.mxu1 %v1769_v56  ;;  %v1793_v56 = vpack.c.bf16 %v435_v51, %v434_v50  ;;  %v1795_v57 = vpack.c.bf16 %v453_v54, %v452_v53 }
 0x152   :  { %1772 = vmatprep.subr.bf16.mxu1 %v1771_v59  ;;  %v437_v59 = vld [vmem:[%s2856_s1 + $0x818] sm:$0xff] }
 0x153   :  { %1742 = vmatpush3.bf16.msra.mxu0 %v1741_v9  ;;  %v455_v9 = vld [vmem:[%s2856_s1 + $0x8a8] sm:$0xff]  ;;  %v1797_v62 = vpack.c.bf16 %v437_v59, %v436_v58 }
 0x154   :  { %1744 = vmatprep.subr.bf16.mxu0 %v1743_v0  ;;  %v1799_v63 = vpack.c.bf16 %v455_v9, %v454_v61  ;;  %v438_v0 = vld [vmem:[%s2856_s1 + $0x820] sm:$0xff] }
 0x155   :  { %1774 = vmatpush3.bf16.msra.mxu1 %v1773_v3 }
 0x156   :  { %1776 = vmatprep.subr.bf16.mxu1 %v1775_v5  ;;  %v458_v5 = vld [vmem:[%s2856_s1 + $0x8c0] sm:$0xff] }
 0x157   :  { %1746 = vmatpush3.bf16.msra.mxu0 %v1745_v8  ;;  %v1807_v8 = vpack.c.bf16 %v459_v6, %v458_v5 }
 0x158   :  { %1748 = vmatprep.subr.bf16.mxu0 %v1747_v12  ;;  %v460_v12 = vld [vmem:[%s2856_s1 + $0x8d0] sm:$0xff] }
 0x159   :  { %1778 = vmatpush3.bf16.msra.mxu1 %v1777_v15  ;;  %v1811_v15 = vpack.c.bf16 %v461_v13, %v460_v12 }
 0x15a   :  { %1780 = vmatprep.subr.bf16.mxu1 %v1779_v19  ;;  %v462_v19 = vld [vmem:[%s2856_s1 + $0x8e0] sm:$0xff] }
 0x15b   :  { %1750 = vmatpush3.bf16.msra.mxu0 %v1749_v23  ;;  %v1815_v23 = vpack.c.bf16 %v463_v20, %v462_v19 }
 0x15c   :  { %1752 = vmatprep.subr.bf16.mxu0 %v1751_v28  ;;  %v464_v28 = vld [vmem:[%s2856_s1 + $0x8f0] sm:$0xff] }
 0x15d   :  { %1782 = vmatpush3.bf16.msra.mxu1 %v1781_v24  ;;  %v1819_v24 = vpack.c.bf16 %v465_v29, %v464_v28 }
 0x15e   :  { %1784 = vmatprep.subr.bf16.mxu1 %v1783_v33  ;;  %v1821_v33 = vpack.c.bf16 %v449_v32, %v448_v31 }
 0x15f   :  { %1754 = vmatpush3.bf16.msra.mxu0 %v1753_v36 }
 0x160   :  { %1756 = vmatprep.subr.bf16.mxu0 %v1755_v40 }
 0x161   :  { %1786 = vmatpush3.bf16.msra.mxu1 %v1785_v42 }
 0x162   :  { %1788 = vmatprep.subr.bf16.mxu1 %v1787_v45 }
 0x163   :  { %1758 = vmatpush3.bf16.msra.mxu0 %v1757_v48 }
 0x164   :  { %1792 = vmatprep.subr.bf16.mxu0 %v1791_v49 }
 0x165   :  { %1790 = vmatpush3.bf16.msra.mxu1 %v1789_v52 }
 0x166   :  { %1050 = vmatmul.mubr.f32.vlgmr.msra.gmra.mrb[6].mxu0 %v2552_v16  ;;  %v457_v16 = vld [vmem:[%s2856_s1 + $0x8b8] sm:$0xff] }
 0x167   :  { %1794 = vmatpush3.bf16.msra.mxu0 %v1793_v56  ;;  %1189 = vmatprep.mubr.f32.mxu0 %v546_v60  ;;  %v1803_v3 = vpack.c.bf16 %v457_v16, %v456_v2  ;;  %v1219_v16 = vld [vmem:[%s2857_s2] ss:$0 sm:$0xff] }
 0x168   :  { %1120 = vmatmul.mubr.f32.vlgmr.msra.gmra.mrb[6].mxu1 %v2567_v25  ;;  %1796 = vmatprep.subr.bf16.mxu0 %v1795_v57  ;;  %v1801_v25 = vpack.c.bf16 %v439_v1, %v438_v0 }
 0x16b   :  { %1798 = vmatpush3.bf16.msra.mxu0 %v1797_v62 }
 0x16c   :  { %1800 = vmatprep.subr.bf16.mxu0 %v1799_v63 }
 0x16f   :  { %1802 = vmatpush3.bf16.msra.mxu0 %v1801_v25 }
 0x170   :  { %1804 = vmatprep.subr.bf16.mxu0 %v1803_v3 }
 0x173   :  { %1806 = vmatpush3.bf16.msra.mxu0 %v1805_v7 }
 0x174   :  { %1808 = vmatprep.subr.bf16.mxu0 %v1807_v8 }
 0x177   :  { %1810 = vmatpush3.bf16.msra.mxu0 %v1809_v14 }
 0x178   :  { %1812 = vmatprep.subr.bf16.mxu0 %v1811_v15 }
 0x17b   :  { %1814 = vmatpush3.bf16.msra.mxu0 %v1813_v21 }
 0x17c   :  { %1816 = vmatprep.subr.bf16.mxu0 %v1815_v23 }
 0x17f   :  { %1818 = vmatpush3.bf16.msra.mxu0 %v1817_v30 }
 0x180   :  { %1820 = vmatprep.subr.bf16.mxu0 %v1819_v24 }
 0x183   :  { %1822 = vmatpush3.bf16.msra.mxu0 %v1821_v33 }
 0x186   :  { %1190 = vmatmul.mubr.f32.vlgmr.msra.gmra.mrb[8].mxu0 %v2755_v55 }
 0x1d9   :  { %v1252_v34 = vpop.f32.mrb[0].mxu0 }
 0x1da   :  { %v1253_v35 = vpop.f32.mrb[1].mxu0 }
 0x1db   :  { %v1254_v36 = vadd.f32 %v1253_v35, %v1252_v34  ;;  %v1287_v37 = vpop.f32.mrb[0].mxu1 }
 0x1dc   :  { %v1288_v38 = vpop.f32.mrb[1].mxu1 }
 0x1dd   :  { %v1289_v40 = vadd.f32 %v1288_v38, %v1287_v37 }
 0x1df   :  { %v702_v39 = vadd.f32 %v1289_v40, %v1254_v36 }
 0x1f9   :  { %v1322_v41 = vpop.f32.mrb[2].mxu0 }
 0x1fa   :  { %v1323_v42 = vpop.f32.mrb[3].mxu0 }
 0x1fb   :  { %v1324_v43 = vadd.f32 %v1323_v42, %v1322_v41  ;;  %v1357_v44 = vpop.f32.mrb[2].mxu1 }
 0x1fc   :  { %v1358_v45 = vpop.f32.mrb[3].mxu1 }
 0x1fd   :  { %v772_v47 = vadd.f32 %v1324_v43, %v702_v39  ;;  %v1359_v46 = vadd.f32 %v1358_v45, %v1357_v44 }
 0x1ff   :  { %v842_v48 = vadd.f32 %v1359_v46, %v772_v47 }
 0x219   :  { %v1392_v49 = vpop.f32.mrb[4].mxu0 }
 0x21a   :  { %v1393_v50 = vpop.f32.mrb[5].mxu0 }
 0x21b   :  { %v1394_v51 = vadd.f32 %v1393_v50, %v1392_v49  ;;  %v1427_v52 = vpop.f32.mrb[4].mxu1 }
 0x21c   :  { %v1428_v53 = vpop.f32.mrb[5].mxu1 }
 0x21d   :  { %v912_v54 = vadd.f32 %v1394_v51, %v842_v48  ;;  %v1429_v55 = vadd.f32 %v1428_v53, %v1427_v52 }
 0x21f   :  { %v982_v56 = vadd.f32 %v1429_v55, %v912_v54 }
 0x239   :  { %v1462_v57 = vpop.f32.mrb[6].mxu0 }
 0x23a   :  { %v1463_v58 = vpop.f32.mrb[7].mxu0 }
 0x23b   :  { %v1464_v59 = vadd.f32 %v1463_v58, %v1462_v57  ;;  %v1497_v60 = vpop.f32.mrb[6].mxu1 }
 0x23c   :  { %v1498_v61 = vpop.f32.mrb[7].mxu1 }
 0x23d   :  { %v1052_v9 = vadd.f32 %v1464_v59, %v982_v56  ;;  %v1499_v62 = vadd.f32 %v1498_v61, %v1497_v60 }
 0x23f   :  { %v1122_v63 = vadd.f32 %v1499_v62, %v1052_v9 }
 0x259   :  { %v1532_v0 = vpop.f32.mrb[8].mxu0 }
 0x25a   :  { %v1533_v1 = vpop.f32.mrb[9].mxu0 }
 0x25b   :  { %v1534_v2 = vadd.f32 %v1533_v1, %v1532_v0 }
 0x25d   :  { %v1192_v25 = vadd.f32 %v1534_v2, %v1122_v63 }
 0x25f   :  { %v1201_v3 = vadd.f32 %v1219_v16, %v1192_v25 }
 0x261   :  { %1203 = vst.msk [vmem:[#allocation4] sm:$0x3] %vm1202_vm10, %v1201_v3 }
 0x262   :  { %1851 = shalt.err (!%p1848_p4)
}
 0x263   :  { %s1852_s22 = scalar_lea.hbm %s2858_s3, 32 }
 0x264   :  { %p1853_p5 = scmp.ne.s32.totalorder %s2858_s3, %s1852_s22  ;;  %p1856_p6 = scmp.lt.u32.totalorder %s1852_s22, %s2858_s3 }
 0x266   :  { %p1858_p7 = pnand %p1856_p6, %p1853_p5 }
 0x268   :  { %1861 = shalt.err (!%p1858_p7)
}
 0x269   :  { %1213 = dma.vmem_to_hbm [thread:$0]  %s1211_s18, 32, %s2858_s3, [#allocation5]  }
 0x26a   :  { %1862 = dma.done.wait [#allocation5], 32  }
 0x26b   :  { %1863 = vsyncadd [#allocation5], 4294967264 }
 0x26c   :  { %1217 = vsyncpa [#allocation5], 1 }

</bundles_post_ra>
